<compile_context>
chip_gen: v7x
topology: tpu7x:2x2x1
jax: 0.10.0
libtpu: 0.0.40
codegen_flags: <defaults>
</compile_context>

<pallas_src>
import jax
import jax.numpy as jnp
from jax.experimental import pallas as pl
from jax.experimental.pallas import tpu as pltpu

HIDDEN = 32
OUTPUT = 16          # vocabulary size
MAX_LENGTH = 10
LANES = 128
ENC_ROWS = 16        # MAX_LENGTH padded up to a sublane multiple

# ---- row layout of the packed (SLAB_ROWS, 128) bf16 parameter slab ----
# All section starts are multiples of 16 (bf16 sublane tile) for clean slices.
R_EMB = 0                         # (OUTPUT, HIDDEN)   embedding table
R_WA = R_EMB + OUTPUT             # (2H, MAX_LENGTH)   attn   [emb-rows | hid-rows]
R_WC = R_WA + 2 * HIDDEN          # (2H, HIDDEN)       attn_combine [emb | att]
R_WG = R_WC + 2 * HIDDEN          # (2H, 4H=128)       fused GRU [r | z | n_in | n_hid]
R_WO = R_WG + 2 * HIDDEN          # (H, OUTPUT)        out
R_BA = R_WO + HIDDEN              # (1, MAX_LENGTH)
R_BC = R_BA + 16                  # (1, HIDDEN)
R_BG = R_BC + 16                  # (1, 4H)            fused GRU bias
R_BO = R_BG + 16                  # (1, OUTPUT)
SLAB_ROWS = R_BO + 16             # 304, multiple of 16

# ---- lane layout of the packed per-step output row ----
OFF_LOGP = 0
OFF_ATTN = OUTPUT
OFF_H = OUTPUT + MAX_LENGTH
PACK_USED = OUTPUT + MAX_LENGTH + HIDDEN


def attn_decoder_kernel(tok_ref, h0_ref, enc_ref, w_ref, out_ref):
    T, B, _ = out_ref.shape
    TB = T * B
    H, V, L = HIDDEN, OUTPUT, MAX_LENGTH
    f32, bf16 = jnp.float32, jnp.bfloat16

    # ---- resident weight views / biases (loaded once, hoisted off the loop) ----
    E = w_ref[R_EMB:R_EMB + V, 0:H]                                  # (V, H)  bf16
    WA_emb = w_ref[R_WA:R_WA + H, 0:L]                               # (H, L)
    WA_hid = w_ref[R_WA + H:R_WA + 2 * H, 0:L]                       # (H, L)
    WC_emb = w_ref[R_WC:R_WC + H, 0:H]                               # (H, H)
    WC_att = w_ref[R_WC + H:R_WC + 2 * H, 0:H]                       # (H, H)
    WG = w_ref[R_WG:R_WG + 2 * H, 0:4 * H]                           # (2H, 128)
    WO = w_ref[R_WO:R_WO + H, 0:V]                                   # (H, V)
    bA = w_ref[R_BA:R_BA + 1, 0:L].astype(f32)
    bC = w_ref[R_BC:R_BC + 1, 0:H].astype(f32)
    bG = w_ref[R_BG:R_BG + 1, 0:4 * H].astype(f32)
    bO = w_ref[R_BO:R_BO + 1, 0:V].astype(f32)
    enc = enc_ref[0:L, 0:H]                                          # (L, H) bf16

    # ---- token-dependent precompute for ALL T steps (off the serial chain) ----
    tok = tok_ref[...]                                               # (T*B, 1) int32
    onehot = (tok == jax.lax.broadcasted_iota(jnp.int32, (TB, V), 1)).astype(bf16)
    emb_all = jnp.dot(onehot, E, preferred_element_type=f32)         # (T*B, H)
    # TODO(synk): nn.Dropout(p=0.1) treated as identity (eval-mode semantics).
    emb_bf = emb_all.astype(bf16)
    sc_emb = jnp.dot(emb_bf, WA_emb, preferred_element_type=f32) + bA   # (T*B, L)
    cb_emb = jnp.dot(emb_bf, WC_emb, preferred_element_type=f32) + bC   # (T*B, H)

    pad = jnp.zeros((B, LANES - PACK_USED), f32)                     # hoisted
    hid = h0_ref[...].astype(f32)                                    # (B, H) carried in vregs

    # Fully unrolled recurrence over the T decode steps.
    for t in range(T):
        hid_bf = hid.astype(bf16)

        # attn(cat(embedded, hidden)) -> softmax over MAX_LENGTH
        sc = sc_emb[t * B:(t + 1) * B] + jnp.dot(
            hid_bf, WA_hid, preferred_element_type=f32)              # (B, L)
        e = jnp.exp(sc - jnp.max(sc, axis=-1, keepdims=True))
        attn_w = e * pl.reciprocal(jnp.sum(e, axis=-1, keepdims=True), approx=True)

        # bmm(attn_weights, encoder_outputs)
        attn_applied = jnp.dot(attn_w.astype(bf16), enc,
                               preferred_element_type=f32)           # (B, H)

        # attn_combine(cat(embedded, attn_applied)) + relu
        x = jnp.maximum(
            cb_emb[t * B:(t + 1) * B]
            + jnp.dot(attn_applied.astype(bf16), WC_att,
                      preferred_element_type=f32), 0.0)              # (B, H)

        # single-step GRU cell: ONE fused (B,2H)@(2H,128) dot, gates (r,z,n)
        g = jnp.dot(jnp.concatenate([x.astype(bf16), hid_bf], axis=1), WG,
                    preferred_element_type=f32) + bG                 # (B, 4H)
        r = jax.nn.sigmoid(g[:, 0:H])
        z = jax.nn.sigmoid(g[:, H:2 * H])
        n = jnp.tanh(g[:, 2 * H:3 * H] + r * g[:, 3 * H:4 * H])
        hid = (1.0 - z) * n + z * hid                                # (B, H)

        # out(h_new) + log_softmax
        logits = jnp.dot(hid.astype(bf16), WO, preferred_element_type=f32) + bO
        shifted = logits - jnp.max(logits, axis=-1, keepdims=True)
        logp = shifted - jnp.log(jnp.sum(jnp.exp(shifted), axis=-1, keepdims=True))

        # pack all per-step outputs into one lane-dense (B, 128) row
        out_ref[t] = jnp.concatenate([logp, attn_w, hid, pad], axis=1)


def pack_params(params):
    """Pack all weights/biases into one lane-dense (SLAB_ROWS, 128) bf16 slab."""
    emb_table, wA, bA, wC, bC, wih, whh, bih, bhh, wo, bo = params
    H = HIDDEN

    # Fused GRU weight/bias: lanes = [r | z | n_in | n_hid] (each H wide).
    w_gru = jnp.zeros((2 * H, 4 * H), jnp.float32)
    w_gru = w_gru.at[0:H, 0:3 * H].set(wih)                    # x rows: r|z|n
    w_gru = w_gru.at[H:2 * H, 0:2 * H].set(whh[:, 0:2 * H])    # h rows: r|z
    w_gru = w_gru.at[H:2 * H, 3 * H:4 * H].set(whh[:, 2 * H:3 * H])  # h rows: n
    b_gru = jnp.concatenate(
        [bih[:, 0:2 * H] + bhh[:, 0:2 * H], bih[:, 2 * H:3 * H], bhh[:, 2 * H:3 * H]],
        axis=1)                                                # (1, 4H)

    slab = jnp.zeros((SLAB_ROWS, LANES), jnp.float32)

    def put(s, row, a):
        return jax.lax.dynamic_update_slice(s, jnp.asarray(a, jnp.float32), (row, 0))

    slab = put(slab, R_EMB, emb_table)
    slab = put(slab, R_WA, wA)
    slab = put(slab, R_WC, wC)
    slab = put(slab, R_WG, w_gru)
    slab = put(slab, R_WO, wo)
    slab = put(slab, R_BA, bA.reshape(1, -1))
    slab = put(slab, R_BC, bC.reshape(1, -1))
    slab = put(slab, R_BG, b_gru.reshape(1, -1))
    slab = put(slab, R_BO, bo.reshape(1, -1))
    return slab.astype(jnp.bfloat16)


@jax.jit
def attn_decoder_decode(tokens, hidden0, encoder_outputs, params):
    """Run T decoder steps for B candidates (shared encoder_outputs).

    tokens: (T, B) int32 in [0, OUTPUT); hidden0: (B, H); encoder_outputs: (L, H).
    Returns (log_probs (T,B,V), attn_weights (T,B,L), hidden_seq (T,B,H)).
    """
    T, B = tokens.shape
    slab = pack_params(params)
    enc_pad = jnp.zeros((ENC_ROWS, LANES), jnp.bfloat16)
    enc_pad = enc_pad.at[:MAX_LENGTH, :HIDDEN].set(
        encoder_outputs.astype(jnp.bfloat16))
    tok2 = tokens.reshape(T * B, 1).astype(jnp.int32)
    h0 = hidden0.reshape(B, HIDDEN).astype(jnp.float32)

    vmem = pl.BlockSpec(memory_space=pltpu.MemorySpace.VMEM)  # whole array, resident
    out = pl.pallas_call(
        attn_decoder_kernel,
        out_shape=jax.ShapeDtypeStruct((T, B, LANES), jnp.float32),
        in_specs=[vmem, vmem, vmem, vmem],   # tokens, h0, encoder, weight slab
        out_specs=vmem,                      # single writeback DMA at kernel end
    )(tok2, h0, enc_pad, slab)

    logp = out[:, :, OFF_LOGP:OFF_LOGP + OUTPUT]
    attn_w = out[:, :, OFF_ATTN:OFF_ATTN + MAX_LENGTH]
    h_seq = out[:, :, OFF_H:OFF_H + HIDDEN]
    return logp, attn_w, h_seq


def reference_decode(tokens, h0, enc, params):
    """Pure-JAX f32 reference: the PyTorch module applied step by step."""
    emb_table, wA, bA, wC, bC, wih, whh, bih, bhh, wo, bo = params
    H = HIDDEN
    h = h0
    logps, attns, hs = [], [], []
    for t in range(tokens.shape[0]):
        emb = emb_table[tokens[t]]                                    # (B, H)
        scores = jnp.concatenate([emb, h], axis=1) @ wA + bA
        aw = jax.nn.softmax(scores, axis=-1)
        applied = aw @ enc
        x = jax.nn.relu(jnp.concatenate([emb, applied], axis=1) @ wC + bC)
        gi = x @ wih + bih
        gh = h @ whh + bhh
        r = jax.nn.sigmoid(gi[:, :H] + gh[:, :H])
        z = jax.nn.sigmoid(gi[:, H:2 * H] + gh[:, H:2 * H])
        n = jnp.tanh(gi[:, 2 * H:] + r * gh[:, 2 * H:])
        h = (1.0 - z) * n + z * h
        logp = jax.nn.log_softmax(h @ wo + bo, axis=-1)
        logps.append(logp)
        attns.append(aw)
        hs.append(h)
    return jnp.stack(logps), jnp.stack(attns), jnp.stack(hs)


def init_params(key):
    ks = jax.random.split(key, 11)

    def u(k, shape):
        return jax.random.uniform(k, shape, jnp.float32, -0.1, 0.1)

    emb_table = u(ks[0], (OUTPUT, HIDDEN))
    wA = u(ks[1], (2 * HIDDEN, MAX_LENGTH))       # attn: [emb|hid] @ wA + bA
    bA = u(ks[2], (1, MAX_LENGTH))
    wC = u(ks[3], (2 * HIDDEN, HIDDEN))           # attn_combine
    bC = u(ks[4], (1, HIDDEN))
    wih = u(ks[5], (HIDDEN, 3 * HIDDEN))          # GRU W_ih, gates (r|z|n) along lanes
    whh = u(ks[6], (HIDDEN, 3 * HIDDEN))
    bih = u(ks[7], (1, 3 * HIDDEN))
    bhh = u(ks[8], (1, 3 * HIDDEN))
    wo = u(ks[9], (HIDDEN, OUTPUT))
    bo = u(ks[10], (1, OUTPUT))
    return (emb_table, wA, bA, wC, bC, wih, whh, bih, bhh, wo, bo)


if __name__ == "__main__":
    key = jax.random.PRNGKey(0)
    k_par, k_tok, k_hid, k_enc = jax.random.split(key, 4)

    B, T = 8, 8                                  # 8 beam candidates, 8 decode steps
    params = init_params(k_par)
    tokens = jax.random.randint(k_tok, (T, B), 0, OUTPUT, dtype=jnp.int32)
    hidden0 = jax.random.normal(k_hid, (B, HIDDEN), jnp.float32)
    encoder_outputs = jax.random.normal(k_enc, (MAX_LENGTH, HIDDEN), jnp.float32)

    logp, attn_w, h_seq = attn_decoder_decode(tokens, hidden0, encoder_outputs, params)
    jax.block_until_ready((logp, attn_w, h_seq))

    assert logp.shape == (T, B, OUTPUT)
    assert attn_w.shape == (T, B, MAX_LENGTH)
    assert h_seq.shape == (T, B, HIDDEN)

    # Numeric cross-check vs. pure-JAX f32 reference. The kernel feeds the MXU
    # bf16 weights/activations (f32 accumulate), so a tolerance-based compare
    # is used.
    logp_r, attn_r, h_r = reference_decode(tokens, hidden0, encoder_outputs, params)
    err = max(float(jnp.max(jnp.abs(logp - logp_r))),
              float(jnp.max(jnp.abs(attn_w - attn_r))),
              float(jnp.max(jnp.abs(h_seq - h_r))))
    assert err < 8e-2, f"mismatch vs reference: {err}"

    print("KERNEL_OK")
</pallas_src>

<mosaic_0001>
module attributes {stable_mosaic.version = 11 : i64} {
  func.func @attn_decoder_kernel(%arg0: memref<64x1xi32, #tpu.memory_space<vmem>>, %arg1: memref<8x32xf32, #tpu.memory_space<vmem>>, %arg2: memref<16x128xbf16, #tpu.memory_space<vmem>>, %arg3: memref<304x128xbf16, #tpu.memory_space<vmem>>, %arg4: memref<8x8x128xf32, #tpu.memory_space<vmem>>) attributes {dimension_semantics = [], scalar_prefetch = 0 : i64, scratch_operands = 0 : i64, tpu.core_type = #tpu.core_type<tc>} {
    %c0 = arith.constant 0 : index
    %c0_0 = arith.constant 0 : index
    %0 = vector.load %arg3[%c0, %c0_0] : memref<304x128xbf16, #tpu.memory_space<vmem>>, vector<16x32xbf16>
    %c16 = arith.constant 16 : index
    %c0_1 = arith.constant 0 : index
    %1 = vector.load %arg3[%c16, %c0_1] : memref<304x128xbf16, #tpu.memory_space<vmem>>, vector<32x10xbf16>
    %c48 = arith.constant 48 : index
    %c0_2 = arith.constant 0 : index
    %2 = vector.load %arg3[%c48, %c0_2] : memref<304x128xbf16, #tpu.memory_space<vmem>>, vector<32x10xbf16>
    %c80 = arith.constant 80 : index
    %c0_3 = arith.constant 0 : index
    %3 = vector.load %arg3[%c80, %c0_3] : memref<304x128xbf16, #tpu.memory_space<vmem>>, vector<32x32xbf16>
    %c112 = arith.constant 112 : index
    %c0_4 = arith.constant 0 : index
    %4 = vector.load %arg3[%c112, %c0_4] : memref<304x128xbf16, #tpu.memory_space<vmem>>, vector<32x32xbf16>
    %c144 = arith.constant 144 : index
    %c0_5 = arith.constant 0 : index
    %5 = vector.load %arg3[%c144, %c0_5] : memref<304x128xbf16, #tpu.memory_space<vmem>>, vector<64x128xbf16>
    %c208 = arith.constant 208 : index
    %c0_6 = arith.constant 0 : index
    %6 = vector.load %arg3[%c208, %c0_6] : memref<304x128xbf16, #tpu.memory_space<vmem>>, vector<32x16xbf16>
    %c240 = arith.constant 240 : index
    %c0_7 = arith.constant 0 : index
    %7 = vector.load %arg3[%c240, %c0_7] : memref<304x128xbf16, #tpu.memory_space<vmem>>, vector<1x10xbf16>
    %8 = arith.extf %7 : vector<1x10xbf16> to vector<1x10xf32>
    %c256 = arith.constant 256 : index
    %c0_8 = arith.constant 0 : index
    %9 = vector.load %arg3[%c256, %c0_8] : memref<304x128xbf16, #tpu.memory_space<vmem>>, vector<1x32xbf16>
    %10 = arith.extf %9 : vector<1x32xbf16> to vector<1x32xf32>
    %c272 = arith.constant 272 : index
    %c0_9 = arith.constant 0 : index
    %11 = vector.load %arg3[%c272, %c0_9] : memref<304x128xbf16, #tpu.memory_space<vmem>>, vector<1x128xbf16>
    %12 = arith.extf %11 : vector<1x128xbf16> to vector<1x128xf32>
    %c288 = arith.constant 288 : index
    %c0_10 = arith.constant 0 : index
    %13 = vector.load %arg3[%c288, %c0_10] : memref<304x128xbf16, #tpu.memory_space<vmem>>, vector<1x16xbf16>
    %14 = arith.extf %13 : vector<1x16xbf16> to vector<1x16xf32>
    %c0_11 = arith.constant 0 : index
    %c0_12 = arith.constant 0 : index
    %15 = vector.load %arg2[%c0_11, %c0_12] : memref<16x128xbf16, #tpu.memory_space<vmem>>, vector<10x32xbf16>
    %c0_13 = arith.constant 0 : index
    %c0_14 = arith.constant 0 : index
    %16 = vector.load %arg0[%c0_13, %c0_14] : memref<64x1xi32, #tpu.memory_space<vmem>>, vector<64x1xi32>
    %17 = tpu.iota {dimensions = array<i32: 1>} : vector<64x16xi32>
    %18 = vector.broadcast %16 : vector<64x1xi32> to vector<64x16xi32>
    %19 = arith.cmpi eq, %18, %17 : vector<64x16xi32>
    %20 = arith.extui %19 : vector<64x16xi1> to vector<64x16xi32>
    %21 = arith.sitofp %20 : vector<64x16xi32> to vector<64x16xf32>
    %22 = arith.truncf %21 : vector<64x16xf32> to vector<64x16xbf16>
    %cst = arith.constant dense<0.000000e+00> : vector<64x32xf32>
    %23 = tpu.matmul %22, %0, %cst {dimension_numbers = #tpu.dot_dimension_numbers<[1], [0], [0], [1], [0, 0, 1, 1], [], []>} : vector<64x16xbf16>, vector<16x32xbf16>, vector<64x32xf32> -> vector<64x32xf32>
    %24 = arith.truncf %23 : vector<64x32xf32> to vector<64x32xbf16>
    %cst_15 = arith.constant dense<0.000000e+00> : vector<64x10xf32>
    %25 = tpu.matmul %24, %1, %cst_15 {dimension_numbers = #tpu.dot_dimension_numbers<[1], [0], [0], [1], [0, 0, 1, 1], [], []>} : vector<64x32xbf16>, vector<32x10xbf16>, vector<64x10xf32> -> vector<64x10xf32>
    %26 = vector.broadcast %8 : vector<1x10xf32> to vector<64x10xf32>
    %27 = arith.addf %25, %26 : vector<64x10xf32>
    %cst_16 = arith.constant dense<0.000000e+00> : vector<64x32xf32>
    %28 = tpu.matmul %24, %3, %cst_16 {dimension_numbers = #tpu.dot_dimension_numbers<[1], [0], [0], [1], [0, 0, 1, 1], [], []>} : vector<64x32xbf16>, vector<32x32xbf16>, vector<64x32xf32> -> vector<64x32xf32>
    %29 = vector.broadcast %10 : vector<1x32xf32> to vector<64x32xf32>
    %30 = arith.addf %28, %29 : vector<64x32xf32>
    %cst_17 = arith.constant 0.000000e+00 : f32
    %31 = vector.broadcast %cst_17 : f32 to vector<8x70xf32>
    %c0_18 = arith.constant 0 : index
    %c0_19 = arith.constant 0 : index
    %32 = vector.load %arg1[%c0_18, %c0_19] : memref<8x32xf32, #tpu.memory_space<vmem>>, vector<8x32xf32>
    %33 = arith.truncf %32 : vector<8x32xf32> to vector<8x32xbf16>
    %34 = vector.extract_strided_slice %27 {offsets = [0, 0], sizes = [8, 10], strides = [1, 1]} : vector<64x10xf32> to vector<8x10xf32>
    %cst_20 = arith.constant dense<0.000000e+00> : vector<8x10xf32>
    %35 = tpu.matmul %33, %2, %cst_20 {dimension_numbers = #tpu.dot_dimension_numbers<[1], [0], [0], [1], [0, 0, 1, 1], [], []>} : vector<8x32xbf16>, vector<32x10xbf16>, vector<8x10xf32> -> vector<8x10xf32>
    %36 = arith.addf %34, %35 : vector<8x10xf32>
    %cst_21 = arith.constant dense<0xFF800000> : vector<8xf32>
    %37 = vector.multi_reduction <maximumf>, %36, %cst_21 [1] : vector<8x10xf32> to vector<8xf32>
    %38 = vector.shape_cast %37 : vector<8xf32> to vector<8x1xf32>
    %39 = vector.broadcast %38 : vector<8x1xf32> to vector<8x10xf32>
    %40 = arith.subf %36, %39 : vector<8x10xf32>
    %41 = math.exp %40 : vector<8x10xf32>
    %cst_22 = arith.constant dense<0.000000e+00> : vector<8xf32>
    %42 = vector.multi_reduction <add>, %41, %cst_22 [1] : vector<8x10xf32> to vector<8xf32>
    %43 = vector.shape_cast %42 : vector<8xf32> to vector<8x1xf32>
    %44 = tpu.reciprocal %43 {approx = true} : vector<8x1xf32> -> vector<8x1xf32>
    %45 = vector.broadcast %44 : vector<8x1xf32> to vector<8x10xf32>
    %46 = arith.mulf %41, %45 : vector<8x10xf32>
    %47 = arith.truncf %46 : vector<8x10xf32> to vector<8x10xbf16>
    %cst_23 = arith.constant dense<0.000000e+00> : vector<8x32xf32>
    %48 = tpu.matmul %47, %15, %cst_23 {dimension_numbers = #tpu.dot_dimension_numbers<[1], [0], [0], [1], [0, 0, 1, 1], [], []>} : vector<8x10xbf16>, vector<10x32xbf16>, vector<8x32xf32> -> vector<8x32xf32>
    %49 = vector.extract_strided_slice %30 {offsets = [0, 0], sizes = [8, 32], strides = [1, 1]} : vector<64x32xf32> to vector<8x32xf32>
    %50 = arith.truncf %48 : vector<8x32xf32> to vector<8x32xbf16>
    %cst_24 = arith.constant dense<0.000000e+00> : vector<8x32xf32>
    %51 = tpu.matmul %50, %4, %cst_24 {dimension_numbers = #tpu.dot_dimension_numbers<[1], [0], [0], [1], [0, 0, 1, 1], [], []>} : vector<8x32xbf16>, vector<32x32xbf16>, vector<8x32xf32> -> vector<8x32xf32>
    %52 = arith.addf %49, %51 : vector<8x32xf32>
    %cst_25 = arith.constant 0.000000e+00 : f32
    %53 = vector.broadcast %cst_25 : f32 to vector<8x32xf32>
    %54 = arith.maximumf %52, %53 : vector<8x32xf32>
    %55 = arith.truncf %54 : vector<8x32xf32> to vector<8x32xbf16>
    %56 = tpu.concatenate %55, %33 in 1 : vector<8x32xbf16>, vector<8x32xbf16> -> vector<8x64xbf16>
    %cst_26 = arith.constant dense<0.000000e+00> : vector<8x128xf32>
    %57 = tpu.matmul %56, %5, %cst_26 {dimension_numbers = #tpu.dot_dimension_numbers<[1], [0], [0], [1], [0, 0, 1, 1], [], []>} : vector<8x64xbf16>, vector<64x128xbf16>, vector<8x128xf32> -> vector<8x128xf32>
    %58 = vector.broadcast %12 : vector<1x128xf32> to vector<8x128xf32>
    %59 = arith.addf %57, %58 : vector<8x128xf32>
    %60 = vector.extract_strided_slice %59 {offsets = [0, 0], sizes = [8, 32], strides = [1, 1]} : vector<8x128xf32> to vector<8x32xf32>
    %61 = arith.negf %60 : vector<8x32xf32>
    %62 = math.exp %61 : vector<8x32xf32>
    %cst_27 = arith.constant 1.000000e+00 : f32
    %63 = vector.broadcast %cst_27 : f32 to vector<8x32xf32>
    %64 = arith.addf %63, %62 : vector<8x32xf32>
    %65 = arith.divf %63, %64 : vector<8x32xf32>
    %66 = vector.extract_strided_slice %59 {offsets = [0, 32], sizes = [8, 32], strides = [1, 1]} : vector<8x128xf32> to vector<8x32xf32>
    %67 = arith.negf %66 : vector<8x32xf32>
    %68 = math.exp %67 : vector<8x32xf32>
    %cst_28 = arith.constant 1.000000e+00 : f32
    %69 = vector.broadcast %cst_28 : f32 to vector<8x32xf32>
    %70 = arith.addf %69, %68 : vector<8x32xf32>
    %71 = arith.divf %69, %70 : vector<8x32xf32>
    %72 = vector.extract_strided_slice %59 {offsets = [0, 64], sizes = [8, 32], strides = [1, 1]} : vector<8x128xf32> to vector<8x32xf32>
    %73 = vector.extract_strided_slice %59 {offsets = [0, 96], sizes = [8, 32], strides = [1, 1]} : vector<8x128xf32> to vector<8x32xf32>
    %74 = arith.mulf %65, %73 : vector<8x32xf32>
    %75 = arith.addf %72, %74 : vector<8x32xf32>
    %76 = math.tanh %75 : vector<8x32xf32>
    %cst_29 = arith.constant 1.000000e+00 : f32
    %77 = vector.broadcast %cst_29 : f32 to vector<8x32xf32>
    %78 = arith.subf %77, %71 : vector<8x32xf32>
    %79 = arith.mulf %78, %76 : vector<8x32xf32>
    %80 = arith.mulf %71, %32 : vector<8x32xf32>
    %81 = arith.addf %79, %80 : vector<8x32xf32>
    %82 = arith.truncf %81 : vector<8x32xf32> to vector<8x32xbf16>
    %cst_30 = arith.constant dense<0.000000e+00> : vector<8x16xf32>
    %83 = tpu.matmul %82, %6, %cst_30 {dimension_numbers = #tpu.dot_dimension_numbers<[1], [0], [0], [1], [0, 0, 1, 1], [], []>} : vector<8x32xbf16>, vector<32x16xbf16>, vector<8x16xf32> -> vector<8x16xf32>
    %84 = vector.broadcast %14 : vector<1x16xf32> to vector<8x16xf32>
    %85 = arith.addf %83, %84 : vector<8x16xf32>
    %cst_31 = arith.constant dense<0xFF800000> : vector<8xf32>
    %86 = vector.multi_reduction <maximumf>, %85, %cst_31 [1] : vector<8x16xf32> to vector<8xf32>
    %87 = vector.shape_cast %86 : vector<8xf32> to vector<8x1xf32>
    %88 = vector.broadcast %87 : vector<8x1xf32> to vector<8x16xf32>
    %89 = arith.subf %85, %88 : vector<8x16xf32>
    %90 = math.exp %89 : vector<8x16xf32>
    %cst_32 = arith.constant dense<0.000000e+00> : vector<8xf32>
    %91 = vector.multi_reduction <add>, %90, %cst_32 [1] : vector<8x16xf32> to vector<8xf32>
    %92 = vector.shape_cast %91 : vector<8xf32> to vector<8x1xf32>
    %93 = math.log %92 : vector<8x1xf32>
    %94 = vector.broadcast %93 : vector<8x1xf32> to vector<8x16xf32>
    %95 = arith.subf %89, %94 : vector<8x16xf32>
    %96 = tpu.concatenate %95, %46, %81, %31 in 1 : vector<8x16xf32>, vector<8x10xf32>, vector<8x32xf32>, vector<8x70xf32> -> vector<8x128xf32>
    %c0_33 = arith.constant 0 : index
    %c0_34 = arith.constant 0 : index
    %c0_35 = arith.constant 0 : index
    %97 = vector.load %arg4[%c0_33, %c0_34, %c0_35] : memref<8x8x128xf32, #tpu.memory_space<vmem>>, vector<1x8x128xf32>
    %98 = vector.shape_cast %97 : vector<1x8x128xf32> to vector<8x128xf32>
    %99 = vector.shape_cast %96 : vector<8x128xf32> to vector<1x8x128xf32>
    tpu.vector_store %arg4[%c0_33, %c0_34, %c0_35], %99 {strides = array<i32>} : memref<8x8x128xf32, #tpu.memory_space<vmem>>, vector<1x8x128xf32>,
    %100 = arith.truncf %81 : vector<8x32xf32> to vector<8x32xbf16>
    %101 = vector.extract_strided_slice %27 {offsets = [8, 0], sizes = [8, 10], strides = [1, 1]} : vector<64x10xf32> to vector<8x10xf32>
    %cst_36 = arith.constant dense<0.000000e+00> : vector<8x10xf32>
    %102 = tpu.matmul %100, %2, %cst_36 {dimension_numbers = #tpu.dot_dimension_numbers<[1], [0], [0], [1], [0, 0, 1, 1], [], []>} : vector<8x32xbf16>, vector<32x10xbf16>, vector<8x10xf32> -> vector<8x10xf32>
    %103 = arith.addf %101, %102 : vector<8x10xf32>
    %cst_37 = arith.constant dense<0xFF800000> : vector<8xf32>
    %104 = vector.multi_reduction <maximumf>, %103, %cst_37 [1] : vector<8x10xf32> to vector<8xf32>
    %105 = vector.shape_cast %104 : vector<8xf32> to vector<8x1xf32>
    %106 = vector.broadcast %105 : vector<8x1xf32> to vector<8x10xf32>
    %107 = arith.subf %103, %106 : vector<8x10xf32>
    %108 = math.exp %107 : vector<8x10xf32>
    %cst_38 = arith.constant dense<0.000000e+00> : vector<8xf32>
    %109 = vector.multi_reduction <add>, %108, %cst_38 [1] : vector<8x10xf32> to vector<8xf32>
    %110 = vector.shape_cast %109 : vector<8xf32> to vector<8x1xf32>
    %111 = tpu.reciprocal %110 {approx = true} : vector<8x1xf32> -> vector<8x1xf32>
    %112 = vector.broadcast %111 : vector<8x1xf32> to vector<8x10xf32>
    %113 = arith.mulf %108, %112 : vector<8x10xf32>
    %114 = arith.truncf %113 : vector<8x10xf32> to vector<8x10xbf16>
    %cst_39 = arith.constant dense<0.000000e+00> : vector<8x32xf32>
    %115 = tpu.matmul %114, %15, %cst_39 {dimension_numbers = #tpu.dot_dimension_numbers<[1], [0], [0], [1], [0, 0, 1, 1], [], []>} : vector<8x10xbf16>, vector<10x32xbf16>, vector<8x32xf32> -> vector<8x32xf32>
    %116 = vector.extract_strided_slice %30 {offsets = [8, 0], sizes = [8, 32], strides = [1, 1]} : vector<64x32xf32> to vector<8x32xf32>
    %117 = arith.truncf %115 : vector<8x32xf32> to vector<8x32xbf16>
    %cst_40 = arith.constant dense<0.000000e+00> : vector<8x32xf32>
    %118 = tpu.matmul %117, %4, %cst_40 {dimension_numbers = #tpu.dot_dimension_numbers<[1], [0], [0], [1], [0, 0, 1, 1], [], []>} : vector<8x32xbf16>, vector<32x32xbf16>, vector<8x32xf32> -> vector<8x32xf32>
    %119 = arith.addf %116, %118 : vector<8x32xf32>
    %cst_41 = arith.constant 0.000000e+00 : f32
    %120 = vector.broadcast %cst_41 : f32 to vector<8x32xf32>
    %121 = arith.maximumf %119, %120 : vector<8x32xf32>
    %122 = arith.truncf %121 : vector<8x32xf32> to vector<8x32xbf16>
    %123 = tpu.concatenate %122, %100 in 1 : vector<8x32xbf16>, vector<8x32xbf16> -> vector<8x64xbf16>
    %cst_42 = arith.constant dense<0.000000e+00> : vector<8x128xf32>
    %124 = tpu.matmul %123, %5, %cst_42 {dimension_numbers = #tpu.dot_dimension_numbers<[1], [0], [0], [1], [0, 0, 1, 1], [], []>} : vector<8x64xbf16>, vector<64x128xbf16>, vector<8x128xf32> -> vector<8x128xf32>
    %125 = vector.broadcast %12 : vector<1x128xf32> to vector<8x128xf32>
    %126 = arith.addf %124, %125 : vector<8x128xf32>
    %127 = vector.extract_strided_slice %126 {offsets = [0, 0], sizes = [8, 32], strides = [1, 1]} : vector<8x128xf32> to vector<8x32xf32>
    %128 = arith.negf %127 : vector<8x32xf32>
    %129 = math.exp %128 : vector<8x32xf32>
    %cst_43 = arith.constant 1.000000e+00 : f32
    %130 = vector.broadcast %cst_43 : f32 to vector<8x32xf32>
    %131 = arith.addf %130, %129 : vector<8x32xf32>
    %132 = arith.divf %130, %131 : vector<8x32xf32>
    %133 = vector.extract_strided_slice %126 {offsets = [0, 32], sizes = [8, 32], strides = [1, 1]} : vector<8x128xf32> to vector<8x32xf32>
    %134 = arith.negf %133 : vector<8x32xf32>
    %135 = math.exp %134 : vector<8x32xf32>
    %cst_44 = arith.constant 1.000000e+00 : f32
    %136 = vector.broadcast %cst_44 : f32 to vector<8x32xf32>
    %137 = arith.addf %136, %135 : vector<8x32xf32>
    %138 = arith.divf %136, %137 : vector<8x32xf32>
    %139 = vector.extract_strided_slice %126 {offsets = [0, 64], sizes = [8, 32], strides = [1, 1]} : vector<8x128xf32> to vector<8x32xf32>
    %140 = vector.extract_strided_slice %126 {offsets = [0, 96], sizes = [8, 32], strides = [1, 1]} : vector<8x128xf32> to vector<8x32xf32>
    %141 = arith.mulf %132, %140 : vector<8x32xf32>
    %142 = arith.addf %139, %141 : vector<8x32xf32>
    %143 = math.tanh %142 : vector<8x32xf32>
    %cst_45 = arith.constant 1.000000e+00 : f32
    %144 = vector.broadcast %cst_45 : f32 to vector<8x32xf32>
    %145 = arith.subf %144, %138 : vector<8x32xf32>
    %146 = arith.mulf %145, %143 : vector<8x32xf32>
    %147 = arith.mulf %138, %81 : vector<8x32xf32>
    %148 = arith.addf %146, %147 : vector<8x32xf32>
    %149 = arith.truncf %148 : vector<8x32xf32> to vector<8x32xbf16>
    %cst_46 = arith.constant dense<0.000000e+00> : vector<8x16xf32>
    %150 = tpu.matmul %149, %6, %cst_46 {dimension_numbers = #tpu.dot_dimension_numbers<[1], [0], [0], [1], [0, 0, 1, 1], [], []>} : vector<8x32xbf16>, vector<32x16xbf16>, vector<8x16xf32> -> vector<8x16xf32>
    %151 = vector.broadcast %14 : vector<1x16xf32> to vector<8x16xf32>
    %152 = arith.addf %150, %151 : vector<8x16xf32>
    %cst_47 = arith.constant dense<0xFF800000> : vector<8xf32>
    %153 = vector.multi_reduction <maximumf>, %152, %cst_47 [1] : vector<8x16xf32> to vector<8xf32>
    %154 = vector.shape_cast %153 : vector<8xf32> to vector<8x1xf32>
    %155 = vector.broadcast %154 : vector<8x1xf32> to vector<8x16xf32>
    %156 = arith.subf %152, %155 : vector<8x16xf32>
    %157 = math.exp %156 : vector<8x16xf32>
    %cst_48 = arith.constant dense<0.000000e+00> : vector<8xf32>
    %158 = vector.multi_reduction <add>, %157, %cst_48 [1] : vector<8x16xf32> to vector<8xf32>
    %159 = vector.shape_cast %158 : vector<8xf32> to vector<8x1xf32>
    %160 = math.log %159 : vector<8x1xf32>
    %161 = vector.broadcast %160 : vector<8x1xf32> to vector<8x16xf32>
    %162 = arith.subf %156, %161 : vector<8x16xf32>
    %163 = tpu.concatenate %162, %113, %148, %31 in 1 : vector<8x16xf32>, vector<8x10xf32>, vector<8x32xf32>, vector<8x70xf32> -> vector<8x128xf32>
    %c1 = arith.constant 1 : index
    %c0_49 = arith.constant 0 : index
    %c0_50 = arith.constant 0 : index
    %164 = vector.load %arg4[%c1, %c0_49, %c0_50] : memref<8x8x128xf32, #tpu.memory_space<vmem>>, vector<1x8x128xf32>
    %165 = vector.shape_cast %164 : vector<1x8x128xf32> to vector<8x128xf32>
    %166 = vector.shape_cast %163 : vector<8x128xf32> to vector<1x8x128xf32>
    tpu.vector_store %arg4[%c1, %c0_49, %c0_50], %166 {strides = array<i32>} : memref<8x8x128xf32, #tpu.memory_space<vmem>>, vector<1x8x128xf32>,
    %167 = arith.truncf %148 : vector<8x32xf32> to vector<8x32xbf16>
    %168 = vector.extract_strided_slice %27 {offsets = [16, 0], sizes = [8, 10], strides = [1, 1]} : vector<64x10xf32> to vector<8x10xf32>
    %cst_51 = arith.constant dense<0.000000e+00> : vector<8x10xf32>
    %169 = tpu.matmul %167, %2, %cst_51 {dimension_numbers = #tpu.dot_dimension_numbers<[1], [0], [0], [1], [0, 0, 1, 1], [], []>} : vector<8x32xbf16>, vector<32x10xbf16>, vector<8x10xf32> -> vector<8x10xf32>
    %170 = arith.addf %168, %169 : vector<8x10xf32>
    %cst_52 = arith.constant dense<0xFF800000> : vector<8xf32>
    %171 = vector.multi_reduction <maximumf>, %170, %cst_52 [1] : vector<8x10xf32> to vector<8xf32>
    %172 = vector.shape_cast %171 : vector<8xf32> to vector<8x1xf32>
    %173 = vector.broadcast %172 : vector<8x1xf32> to vector<8x10xf32>
    %174 = arith.subf %170, %173 : vector<8x10xf32>
    %175 = math.exp %174 : vector<8x10xf32>
    %cst_53 = arith.constant dense<0.000000e+00> : vector<8xf32>
    %176 = vector.multi_reduction <add>, %175, %cst_53 [1] : vector<8x10xf32> to vector<8xf32>
    %177 = vector.shape_cast %176 : vector<8xf32> to vector<8x1xf32>
    %178 = tpu.reciprocal %177 {approx = true} : vector<8x1xf32> -> vector<8x1xf32>
    %179 = vector.broadcast %178 : vector<8x1xf32> to vector<8x10xf32>
    %180 = arith.mulf %175, %179 : vector<8x10xf32>
    %181 = arith.truncf %180 : vector<8x10xf32> to vector<8x10xbf16>
    %cst_54 = arith.constant dense<0.000000e+00> : vector<8x32xf32>
    %182 = tpu.matmul %181, %15, %cst_54 {dimension_numbers = #tpu.dot_dimension_numbers<[1], [0], [0], [1], [0, 0, 1, 1], [], []>} : vector<8x10xbf16>, vector<10x32xbf16>, vector<8x32xf32> -> vector<8x32xf32>
    %183 = vector.extract_strided_slice %30 {offsets = [16, 0], sizes = [8, 32], strides = [1, 1]} : vector<64x32xf32> to vector<8x32xf32>
    %184 = arith.truncf %182 : vector<8x32xf32> to vector<8x32xbf16>
    %cst_55 = arith.constant dense<0.000000e+00> : vector<8x32xf32>
    %185 = tpu.matmul %184, %4, %cst_55 {dimension_numbers = #tpu.dot_dimension_numbers<[1], [0], [0], [1], [0, 0, 1, 1], [], []>} : vector<8x32xbf16>, vector<32x32xbf16>, vector<8x32xf32> -> vector<8x32xf32>
    %186 = arith.addf %183, %185 : vector<8x32xf32>
    %cst_56 = arith.constant 0.000000e+00 : f32
    %187 = vector.broadcast %cst_56 : f32 to vector<8x32xf32>
    %188 = arith.maximumf %186, %187 : vector<8x32xf32>
    %189 = arith.truncf %188 : vector<8x32xf32> to vector<8x32xbf16>
    %190 = tpu.concatenate %189, %167 in 1 : vector<8x32xbf16>, vector<8x32xbf16> -> vector<8x64xbf16>
    %cst_57 = arith.constant dense<0.000000e+00> : vector<8x128xf32>
    %191 = tpu.matmul %190, %5, %cst_57 {dimension_numbers = #tpu.dot_dimension_numbers<[1], [0], [0], [1], [0, 0, 1, 1], [], []>} : vector<8x64xbf16>, vector<64x128xbf16>, vector<8x128xf32> -> vector<8x128xf32>
    %192 = vector.broadcast %12 : vector<1x128xf32> to vector<8x128xf32>
    %193 = arith.addf %191, %192 : vector<8x128xf32>
    %194 = vector.extract_strided_slice %193 {offsets = [0, 0], sizes = [8, 32], strides = [1, 1]} : vector<8x128xf32> to vector<8x32xf32>
    %195 = arith.negf %194 : vector<8x32xf32>
    %196 = math.exp %195 : vector<8x32xf32>
    %cst_58 = arith.constant 1.000000e+00 : f32
    %197 = vector.broadcast %cst_58 : f32 to vector<8x32xf32>
    %198 = arith.addf %197, %196 : vector<8x32xf32>
    %199 = arith.divf %197, %198 : vector<8x32xf32>
    %200 = vector.extract_strided_slice %193 {offsets = [0, 32], sizes = [8, 32], strides = [1, 1]} : vector<8x128xf32> to vector<8x32xf32>
    %201 = arith.negf %200 : vector<8x32xf32>
    %202 = math.exp %201 : vector<8x32xf32>
    %cst_59 = arith.constant 1.000000e+00 : f32
    %203 = vector.broadcast %cst_59 : f32 to vector<8x32xf32>
    %204 = arith.addf %203, %202 : vector<8x32xf32>
    %205 = arith.divf %203, %204 : vector<8x32xf32>
    %206 = vector.extract_strided_slice %193 {offsets = [0, 64], sizes = [8, 32], strides = [1, 1]} : vector<8x128xf32> to vector<8x32xf32>
    %207 = vector.extract_strided_slice %193 {offsets = [0, 96], sizes = [8, 32], strides = [1, 1]} : vector<8x128xf32> to vector<8x32xf32>
    %208 = arith.mulf %199, %207 : vector<8x32xf32>
    %209 = arith.addf %206, %208 : vector<8x32xf32>
    %210 = math.tanh %209 : vector<8x32xf32>
    %cst_60 = arith.constant 1.000000e+00 : f32
    %211 = vector.broadcast %cst_60 : f32 to vector<8x32xf32>
    %212 = arith.subf %211, %205 : vector<8x32xf32>
    %213 = arith.mulf %212, %210 : vector<8x32xf32>
    %214 = arith.mulf %205, %148 : vector<8x32xf32>
    %215 = arith.addf %213, %214 : vector<8x32xf32>
    %216 = arith.truncf %215 : vector<8x32xf32> to vector<8x32xbf16>
    %cst_61 = arith.constant dense<0.000000e+00> : vector<8x16xf32>
    %217 = tpu.matmul %216, %6, %cst_61 {dimension_numbers = #tpu.dot_dimension_numbers<[1], [0], [0], [1], [0, 0, 1, 1], [], []>} : vector<8x32xbf16>, vector<32x16xbf16>, vector<8x16xf32> -> vector<8x16xf32>
    %218 = vector.broadcast %14 : vector<1x16xf32> to vector<8x16xf32>
    %219 = arith.addf %217, %218 : vector<8x16xf32>
    %cst_62 = arith.constant dense<0xFF800000> : vector<8xf32>
    %220 = vector.multi_reduction <maximumf>, %219, %cst_62 [1] : vector<8x16xf32> to vector<8xf32>
    %221 = vector.shape_cast %220 : vector<8xf32> to vector<8x1xf32>
    %222 = vector.broadcast %221 : vector<8x1xf32> to vector<8x16xf32>
    %223 = arith.subf %219, %222 : vector<8x16xf32>
    %224 = math.exp %223 : vector<8x16xf32>
    %cst_63 = arith.constant dense<0.000000e+00> : vector<8xf32>
    %225 = vector.multi_reduction <add>, %224, %cst_63 [1] : vector<8x16xf32> to vector<8xf32>
    %226 = vector.shape_cast %225 : vector<8xf32> to vector<8x1xf32>
    %227 = math.log %226 : vector<8x1xf32>
    %228 = vector.broadcast %227 : vector<8x1xf32> to vector<8x16xf32>
    %229 = arith.subf %223, %228 : vector<8x16xf32>
    %230 = tpu.concatenate %229, %180, %215, %31 in 1 : vector<8x16xf32>, vector<8x10xf32>, vector<8x32xf32>, vector<8x70xf32> -> vector<8x128xf32>
    %c2 = arith.constant 2 : index
    %c0_64 = arith.constant 0 : index
    %c0_65 = arith.constant 0 : index
    %231 = vector.load %arg4[%c2, %c0_64, %c0_65] : memref<8x8x128xf32, #tpu.memory_space<vmem>>, vector<1x8x128xf32>
    %232 = vector.shape_cast %231 : vector<1x8x128xf32> to vector<8x128xf32>
    %233 = vector.shape_cast %230 : vector<8x128xf32> to vector<1x8x128xf32>
    tpu.vector_store %arg4[%c2, %c0_64, %c0_65], %233 {strides = array<i32>} : memref<8x8x128xf32, #tpu.memory_space<vmem>>, vector<1x8x128xf32>,
    %234 = arith.truncf %215 : vector<8x32xf32> to vector<8x32xbf16>
    %235 = vector.extract_strided_slice %27 {offsets = [24, 0], sizes = [8, 10], strides = [1, 1]} : vector<64x10xf32> to vector<8x10xf32>
    %cst_66 = arith.constant dense<0.000000e+00> : vector<8x10xf32>
    %236 = tpu.matmul %234, %2, %cst_66 {dimension_numbers = #tpu.dot_dimension_numbers<[1], [0], [0], [1], [0, 0, 1, 1], [], []>} : vector<8x32xbf16>, vector<32x10xbf16>, vector<8x10xf32> -> vector<8x10xf32>
    %237 = arith.addf %235, %236 : vector<8x10xf32>
    %cst_67 = arith.constant dense<0xFF800000> : vector<8xf32>
    %238 = vector.multi_reduction <maximumf>, %237, %cst_67 [1] : vector<8x10xf32> to vector<8xf32>
    %239 = vector.shape_cast %238 : vector<8xf32> to vector<8x1xf32>
    %240 = vector.broadcast %239 : vector<8x1xf32> to vector<8x10xf32>
    %241 = arith.subf %237, %240 : vector<8x10xf32>
    %242 = math.exp %241 : vector<8x10xf32>
    %cst_68 = arith.constant dense<0.000000e+00> : vector<8xf32>
    %243 = vector.multi_reduction <add>, %242, %cst_68 [1] : vector<8x10xf32> to vector<8xf32>
    %244 = vector.shape_cast %243 : vector<8xf32> to vector<8x1xf32>
    %245 = tpu.reciprocal %244 {approx = true} : vector<8x1xf32> -> vector<8x1xf32>
    %246 = vector.broadcast %245 : vector<8x1xf32> to vector<8x10xf32>
    %247 = arith.mulf %242, %246 : vector<8x10xf32>
    %248 = arith.truncf %247 : vector<8x10xf32> to vector<8x10xbf16>
    %cst_69 = arith.constant dense<0.000000e+00> : vector<8x32xf32>
    %249 = tpu.matmul %248, %15, %cst_69 {dimension_numbers = #tpu.dot_dimension_numbers<[1], [0], [0], [1], [0, 0, 1, 1], [], []>} : vector<8x10xbf16>, vector<10x32xbf16>, vector<8x32xf32> -> vector<8x32xf32>
    %250 = vector.extract_strided_slice %30 {offsets = [24, 0], sizes = [8, 32], strides = [1, 1]} : vector<64x32xf32> to vector<8x32xf32>
    %251 = arith.truncf %249 : vector<8x32xf32> to vector<8x32xbf16>
    %cst_70 = arith.constant dense<0.000000e+00> : vector<8x32xf32>
    %252 = tpu.matmul %251, %4, %cst_70 {dimension_numbers = #tpu.dot_dimension_numbers<[1], [0], [0], [1], [0, 0, 1, 1], [], []>} : vector<8x32xbf16>, vector<32x32xbf16>, vector<8x32xf32> -> vector<8x32xf32>
    %253 = arith.addf %250, %252 : vector<8x32xf32>
    %cst_71 = arith.constant 0.000000e+00 : f32
    %254 = vector.broadcast %cst_71 : f32 to vector<8x32xf32>
    %255 = arith.maximumf %253, %254 : vector<8x32xf32>
    %256 = arith.truncf %255 : vector<8x32xf32> to vector<8x32xbf16>
    %257 = tpu.concatenate %256, %234 in 1 : vector<8x32xbf16>, vector<8x32xbf16> -> vector<8x64xbf16>
    %cst_72 = arith.constant dense<0.000000e+00> : vector<8x128xf32>
    %258 = tpu.matmul %257, %5, %cst_72 {dimension_numbers = #tpu.dot_dimension_numbers<[1], [0], [0], [1], [0, 0, 1, 1], [], []>} : vector<8x64xbf16>, vector<64x128xbf16>, vector<8x128xf32> -> vector<8x128xf32>
    %259 = vector.broadcast %12 : vector<1x128xf32> to vector<8x128xf32>
    %260 = arith.addf %258, %259 : vector<8x128xf32>
    %261 = vector.extract_strided_slice %260 {offsets = [0, 0], sizes = [8, 32], strides = [1, 1]} : vector<8x128xf32> to vector<8x32xf32>
    %262 = arith.negf %261 : vector<8x32xf32>
    %263 = math.exp %262 : vector<8x32xf32>
    %cst_73 = arith.constant 1.000000e+00 : f32
    %264 = vector.broadcast %cst_73 : f32 to vector<8x32xf32>
    %265 = arith.addf %264, %263 : vector<8x32xf32>
    %266 = arith.divf %264, %265 : vector<8x32xf32>
    %267 = vector.extract_strided_slice %260 {offsets = [0, 32], sizes = [8, 32], strides = [1, 1]} : vector<8x128xf32> to vector<8x32xf32>
    %268 = arith.negf %267 : vector<8x32xf32>
    %269 = math.exp %268 : vector<8x32xf32>
    %cst_74 = arith.constant 1.000000e+00 : f32
    %270 = vector.broadcast %cst_74 : f32 to vector<8x32xf32>
    %271 = arith.addf %270, %269 : vector<8x32xf32>
    %272 = arith.divf %270, %271 : vector<8x32xf32>
    %273 = vector.extract_strided_slice %260 {offsets = [0, 64], sizes = [8, 32], strides = [1, 1]} : vector<8x128xf32> to vector<8x32xf32>
    %274 = vector.extract_strided_slice %260 {offsets = [0, 96], sizes = [8, 32], strides = [1, 1]} : vector<8x128xf32> to vector<8x32xf32>
    %275 = arith.mulf %266, %274 : vector<8x32xf32>
    %276 = arith.addf %273, %275 : vector<8x32xf32>
    %277 = math.tanh %276 : vector<8x32xf32>
    %cst_75 = arith.constant 1.000000e+00 : f32
    %278 = vector.broadcast %cst_75 : f32 to vector<8x32xf32>
    %279 = arith.subf %278, %272 : vector<8x32xf32>
    %280 = arith.mulf %279, %277 : vector<8x32xf32>
    %281 = arith.mulf %272, %215 : vector<8x32xf32>
    %282 = arith.addf %280, %281 : vector<8x32xf32>
    %283 = arith.truncf %282 : vector<8x32xf32> to vector<8x32xbf16>
    %cst_76 = arith.constant dense<0.000000e+00> : vector<8x16xf32>
    %284 = tpu.matmul %283, %6, %cst_76 {dimension_numbers = #tpu.dot_dimension_numbers<[1], [0], [0], [1], [0, 0, 1, 1], [], []>} : vector<8x32xbf16>, vector<32x16xbf16>, vector<8x16xf32> -> vector<8x16xf32>
    %285 = vector.broadcast %14 : vector<1x16xf32> to vector<8x16xf32>
    %286 = arith.addf %284, %285 : vector<8x16xf32>
    %cst_77 = arith.constant dense<0xFF800000> : vector<8xf32>
    %287 = vector.multi_reduction <maximumf>, %286, %cst_77 [1] : vector<8x16xf32> to vector<8xf32>
    %288 = vector.shape_cast %287 : vector<8xf32> to vector<8x1xf32>
    %289 = vector.broadcast %288 : vector<8x1xf32> to vector<8x16xf32>
    %290 = arith.subf %286, %289 : vector<8x16xf32>
    %291 = math.exp %290 : vector<8x16xf32>
    %cst_78 = arith.constant dense<0.000000e+00> : vector<8xf32>
    %292 = vector.multi_reduction <add>, %291, %cst_78 [1] : vector<8x16xf32> to vector<8xf32>
    %293 = vector.shape_cast %292 : vector<8xf32> to vector<8x1xf32>
    %294 = math.log %293 : vector<8x1xf32>
    %295 = vector.broadcast %294 : vector<8x1xf32> to vector<8x16xf32>
    %296 = arith.subf %290, %295 : vector<8x16xf32>
    %297 = tpu.concatenate %296, %247, %282, %31 in 1 : vector<8x16xf32>, vector<8x10xf32>, vector<8x32xf32>, vector<8x70xf32> -> vector<8x128xf32>
    %c3 = arith.constant 3 : index
    %c0_79 = arith.constant 0 : index
    %c0_80 = arith.constant 0 : index
    %298 = vector.load %arg4[%c3, %c0_79, %c0_80] : memref<8x8x128xf32, #tpu.memory_space<vmem>>, vector<1x8x128xf32>
    %299 = vector.shape_cast %298 : vector<1x8x128xf32> to vector<8x128xf32>
    %300 = vector.shape_cast %297 : vector<8x128xf32> to vector<1x8x128xf32>
    tpu.vector_store %arg4[%c3, %c0_79, %c0_80], %300 {strides = array<i32>} : memref<8x8x128xf32, #tpu.memory_space<vmem>>, vector<1x8x128xf32>,
    %301 = arith.truncf %282 : vector<8x32xf32> to vector<8x32xbf16>
    %302 = vector.extract_strided_slice %27 {offsets = [32, 0], sizes = [8, 10], strides = [1, 1]} : vector<64x10xf32> to vector<8x10xf32>
    %cst_81 = arith.constant dense<0.000000e+00> : vector<8x10xf32>
    %303 = tpu.matmul %301, %2, %cst_81 {dimension_numbers = #tpu.dot_dimension_numbers<[1], [0], [0], [1], [0, 0, 1, 1], [], []>} : vector<8x32xbf16>, vector<32x10xbf16>, vector<8x10xf32> -> vector<8x10xf32>
    %304 = arith.addf %302, %303 : vector<8x10xf32>
    %cst_82 = arith.constant dense<0xFF800000> : vector<8xf32>
    %305 = vector.multi_reduction <maximumf>, %304, %cst_82 [1] : vector<8x10xf32> to vector<8xf32>
    %306 = vector.shape_cast %305 : vector<8xf32> to vector<8x1xf32>
    %307 = vector.broadcast %306 : vector<8x1xf32> to vector<8x10xf32>
    %308 = arith.subf %304, %307 : vector<8x10xf32>
    %309 = math.exp %308 : vector<8x10xf32>
    %cst_83 = arith.constant dense<0.000000e+00> : vector<8xf32>
    %310 = vector.multi_reduction <add>, %309, %cst_83 [1] : vector<8x10xf32> to vector<8xf32>
    %311 = vector.shape_cast %310 : vector<8xf32> to vector<8x1xf32>
    %312 = tpu.reciprocal %311 {approx = true} : vector<8x1xf32> -> vector<8x1xf32>
    %313 = vector.broadcast %312 : vector<8x1xf32> to vector<8x10xf32>
    %314 = arith.mulf %309, %313 : vector<8x10xf32>
    %315 = arith.truncf %314 : vector<8x10xf32> to vector<8x10xbf16>
    %cst_84 = arith.constant dense<0.000000e+00> : vector<8x32xf32>
    %316 = tpu.matmul %315, %15, %cst_84 {dimension_numbers = #tpu.dot_dimension_numbers<[1], [0], [0], [1], [0, 0, 1, 1], [], []>} : vector<8x10xbf16>, vector<10x32xbf16>, vector<8x32xf32> -> vector<8x32xf32>
    %317 = vector.extract_strided_slice %30 {offsets = [32, 0], sizes = [8, 32], strides = [1, 1]} : vector<64x32xf32> to vector<8x32xf32>
    %318 = arith.truncf %316 : vector<8x32xf32> to vector<8x32xbf16>
    %cst_85 = arith.constant dense<0.000000e+00> : vector<8x32xf32>
    %319 = tpu.matmul %318, %4, %cst_85 {dimension_numbers = #tpu.dot_dimension_numbers<[1], [0], [0], [1], [0, 0, 1, 1], [], []>} : vector<8x32xbf16>, vector<32x32xbf16>, vector<8x32xf32> -> vector<8x32xf32>
    %320 = arith.addf %317, %319 : vector<8x32xf32>
    %cst_86 = arith.constant 0.000000e+00 : f32
    %321 = vector.broadcast %cst_86 : f32 to vector<8x32xf32>
    %322 = arith.maximumf %320, %321 : vector<8x32xf32>
    %323 = arith.truncf %322 : vector<8x32xf32> to vector<8x32xbf16>
    %324 = tpu.concatenate %323, %301 in 1 : vector<8x32xbf16>, vector<8x32xbf16> -> vector<8x64xbf16>
    %cst_87 = arith.constant dense<0.000000e+00> : vector<8x128xf32>
    %325 = tpu.matmul %324, %5, %cst_87 {dimension_numbers = #tpu.dot_dimension_numbers<[1], [0], [0], [1], [0, 0, 1, 1], [], []>} : vector<8x64xbf16>, vector<64x128xbf16>, vector<8x128xf32> -> vector<8x128xf32>
    %326 = vector.broadcast %12 : vector<1x128xf32> to vector<8x128xf32>
    %327 = arith.addf %325, %326 : vector<8x128xf32>
    %328 = vector.extract_strided_slice %327 {offsets = [0, 0], sizes = [8, 32], strides = [1, 1]} : vector<8x128xf32> to vector<8x32xf32>
    %329 = arith.negf %328 : vector<8x32xf32>
    %330 = math.exp %329 : vector<8x32xf32>
    %cst_88 = arith.constant 1.000000e+00 : f32
    %331 = vector.broadcast %cst_88 : f32 to vector<8x32xf32>
    %332 = arith.addf %331, %330 : vector<8x32xf32>
    %333 = arith.divf %331, %332 : vector<8x32xf32>
    %334 = vector.extract_strided_slice %327 {offsets = [0, 32], sizes = [8, 32], strides = [1, 1]} : vector<8x128xf32> to vector<8x32xf32>
    %335 = arith.negf %334 : vector<8x32xf32>
    %336 = math.exp %335 : vector<8x32xf32>
    %cst_89 = arith.constant 1.000000e+00 : f32
    %337 = vector.broadcast %cst_89 : f32 to vector<8x32xf32>
    %338 = arith.addf %337, %336 : vector<8x32xf32>
    %339 = arith.divf %337, %338 : vector<8x32xf32>
    %340 = vector.extract_strided_slice %327 {offsets = [0, 64], sizes = [8, 32], strides = [1, 1]} : vector<8x128xf32> to vector<8x32xf32>
    %341 = vector.extract_strided_slice %327 {offsets = [0, 96], sizes = [8, 32], strides = [1, 1]} : vector<8x128xf32> to vector<8x32xf32>
    %342 = arith.mulf %333, %341 : vector<8x32xf32>
    %343 = arith.addf %340, %342 : vector<8x32xf32>
    %344 = math.tanh %343 : vector<8x32xf32>
    %cst_90 = arith.constant 1.000000e+00 : f32
    %345 = vector.broadcast %cst_90 : f32 to vector<8x32xf32>
    %346 = arith.subf %345, %339 : vector<8x32xf32>
    %347 = arith.mulf %346, %344 : vector<8x32xf32>
    %348 = arith.mulf %339, %282 : vector<8x32xf32>
    %349 = arith.addf %347, %348 : vector<8x32xf32>
    %350 = arith.truncf %349 : vector<8x32xf32> to vector<8x32xbf16>
    %cst_91 = arith.constant dense<0.000000e+00> : vector<8x16xf32>
    %351 = tpu.matmul %350, %6, %cst_91 {dimension_numbers = #tpu.dot_dimension_numbers<[1], [0], [0], [1], [0, 0, 1, 1], [], []>} : vector<8x32xbf16>, vector<32x16xbf16>, vector<8x16xf32> -> vector<8x16xf32>
    %352 = vector.broadcast %14 : vector<1x16xf32> to vector<8x16xf32>
    %353 = arith.addf %351, %352 : vector<8x16xf32>
    %cst_92 = arith.constant dense<0xFF800000> : vector<8xf32>
    %354 = vector.multi_reduction <maximumf>, %353, %cst_92 [1] : vector<8x16xf32> to vector<8xf32>
    %355 = vector.shape_cast %354 : vector<8xf32> to vector<8x1xf32>
    %356 = vector.broadcast %355 : vector<8x1xf32> to vector<8x16xf32>
    %357 = arith.subf %353, %356 : vector<8x16xf32>
    %358 = math.exp %357 : vector<8x16xf32>
    %cst_93 = arith.constant dense<0.000000e+00> : vector<8xf32>
    %359 = vector.multi_reduction <add>, %358, %cst_93 [1] : vector<8x16xf32> to vector<8xf32>
    %360 = vector.shape_cast %359 : vector<8xf32> to vector<8x1xf32>
    %361 = math.log %360 : vector<8x1xf32>
    %362 = vector.broadcast %361 : vector<8x1xf32> to vector<8x16xf32>
    %363 = arith.subf %357, %362 : vector<8x16xf32>
    %364 = tpu.concatenate %363, %314, %349, %31 in 1 : vector<8x16xf32>, vector<8x10xf32>, vector<8x32xf32>, vector<8x70xf32> -> vector<8x128xf32>
    %c4 = arith.constant 4 : index
    %c0_94 = arith.constant 0 : index
    %c0_95 = arith.constant 0 : index
    %365 = vector.load %arg4[%c4, %c0_94, %c0_95] : memref<8x8x128xf32, #tpu.memory_space<vmem>>, vector<1x8x128xf32>
    %366 = vector.shape_cast %365 : vector<1x8x128xf32> to vector<8x128xf32>
    %367 = vector.shape_cast %364 : vector<8x128xf32> to vector<1x8x128xf32>
    tpu.vector_store %arg4[%c4, %c0_94, %c0_95], %367 {strides = array<i32>} : memref<8x8x128xf32, #tpu.memory_space<vmem>>, vector<1x8x128xf32>,
    %368 = arith.truncf %349 : vector<8x32xf32> to vector<8x32xbf16>
    %369 = vector.extract_strided_slice %27 {offsets = [40, 0], sizes = [8, 10], strides = [1, 1]} : vector<64x10xf32> to vector<8x10xf32>
    %cst_96 = arith.constant dense<0.000000e+00> : vector<8x10xf32>
    %370 = tpu.matmul %368, %2, %cst_96 {dimension_numbers = #tpu.dot_dimension_numbers<[1], [0], [0], [1], [0, 0, 1, 1], [], []>} : vector<8x32xbf16>, vector<32x10xbf16>, vector<8x10xf32> -> vector<8x10xf32>
    %371 = arith.addf %369, %370 : vector<8x10xf32>
    %cst_97 = arith.constant dense<0xFF800000> : vector<8xf32>
    %372 = vector.multi_reduction <maximumf>, %371, %cst_97 [1] : vector<8x10xf32> to vector<8xf32>
    %373 = vector.shape_cast %372 : vector<8xf32> to vector<8x1xf32>
    %374 = vector.broadcast %373 : vector<8x1xf32> to vector<8x10xf32>
    %375 = arith.subf %371, %374 : vector<8x10xf32>
    %376 = math.exp %375 : vector<8x10xf32>
    %cst_98 = arith.constant dense<0.000000e+00> : vector<8xf32>
    %377 = vector.multi_reduction <add>, %376, %cst_98 [1] : vector<8x10xf32> to vector<8xf32>
    %378 = vector.shape_cast %377 : vector<8xf32> to vector<8x1xf32>
    %379 = tpu.reciprocal %378 {approx = true} : vector<8x1xf32> -> vector<8x1xf32>
    %380 = vector.broadcast %379 : vector<8x1xf32> to vector<8x10xf32>
    %381 = arith.mulf %376, %380 : vector<8x10xf32>
    %382 = arith.truncf %381 : vector<8x10xf32> to vector<8x10xbf16>
    %cst_99 = arith.constant dense<0.000000e+00> : vector<8x32xf32>
    %383 = tpu.matmul %382, %15, %cst_99 {dimension_numbers = #tpu.dot_dimension_numbers<[1], [0], [0], [1], [0, 0, 1, 1], [], []>} : vector<8x10xbf16>, vector<10x32xbf16>, vector<8x32xf32> -> vector<8x32xf32>
    %384 = vector.extract_strided_slice %30 {offsets = [40, 0], sizes = [8, 32], strides = [1, 1]} : vector<64x32xf32> to vector<8x32xf32>
    %385 = arith.truncf %383 : vector<8x32xf32> to vector<8x32xbf16>
    %cst_100 = arith.constant dense<0.000000e+00> : vector<8x32xf32>
    %386 = tpu.matmul %385, %4, %cst_100 {dimension_numbers = #tpu.dot_dimension_numbers<[1], [0], [0], [1], [0, 0, 1, 1], [], []>} : vector<8x32xbf16>, vector<32x32xbf16>, vector<8x32xf32> -> vector<8x32xf32>
    %387 = arith.addf %384, %386 : vector<8x32xf32>
    %cst_101 = arith.constant 0.000000e+00 : f32
    %388 = vector.broadcast %cst_101 : f32 to vector<8x32xf32>
    %389 = arith.maximumf %387, %388 : vector<8x32xf32>
    %390 = arith.truncf %389 : vector<8x32xf32> to vector<8x32xbf16>
    %391 = tpu.concatenate %390, %368 in 1 : vector<8x32xbf16>, vector<8x32xbf16> -> vector<8x64xbf16>
    %cst_102 = arith.constant dense<0.000000e+00> : vector<8x128xf32>
    %392 = tpu.matmul %391, %5, %cst_102 {dimension_numbers = #tpu.dot_dimension_numbers<[1], [0], [0], [1], [0, 0, 1, 1], [], []>} : vector<8x64xbf16>, vector<64x128xbf16>, vector<8x128xf32> -> vector<8x128xf32>
    %393 = vector.broadcast %12 : vector<1x128xf32> to vector<8x128xf32>
    %394 = arith.addf %392, %393 : vector<8x128xf32>
    %395 = vector.extract_strided_slice %394 {offsets = [0, 0], sizes = [8, 32], strides = [1, 1]} : vector<8x128xf32> to vector<8x32xf32>
    %396 = arith.negf %395 : vector<8x32xf32>
    %397 = math.exp %396 : vector<8x32xf32>
    %cst_103 = arith.constant 1.000000e+00 : f32
    %398 = vector.broadcast %cst_103 : f32 to vector<8x32xf32>
    %399 = arith.addf %398, %397 : vector<8x32xf32>
    %400 = arith.divf %398, %399 : vector<8x32xf32>
    %401 = vector.extract_strided_slice %394 {offsets = [0, 32], sizes = [8, 32], strides = [1, 1]} : vector<8x128xf32> to vector<8x32xf32>
    %402 = arith.negf %401 : vector<8x32xf32>
    %403 = math.exp %402 : vector<8x32xf32>
    %cst_104 = arith.constant 1.000000e+00 : f32
    %404 = vector.broadcast %cst_104 : f32 to vector<8x32xf32>
    %405 = arith.addf %404, %403 : vector<8x32xf32>
    %406 = arith.divf %404, %405 : vector<8x32xf32>
    %407 = vector.extract_strided_slice %394 {offsets = [0, 64], sizes = [8, 32], strides = [1, 1]} : vector<8x128xf32> to vector<8x32xf32>
    %408 = vector.extract_strided_slice %394 {offsets = [0, 96], sizes = [8, 32], strides = [1, 1]} : vector<8x128xf32> to vector<8x32xf32>
    %409 = arith.mulf %400, %408 : vector<8x32xf32>
    %410 = arith.addf %407, %409 : vector<8x32xf32>
    %411 = math.tanh %410 : vector<8x32xf32>
    %cst_105 = arith.constant 1.000000e+00 : f32
    %412 = vector.broadcast %cst_105 : f32 to vector<8x32xf32>
    %413 = arith.subf %412, %406 : vector<8x32xf32>
    %414 = arith.mulf %413, %411 : vector<8x32xf32>
    %415 = arith.mulf %406, %349 : vector<8x32xf32>
    %416 = arith.addf %414, %415 : vector<8x32xf32>
    %417 = arith.truncf %416 : vector<8x32xf32> to vector<8x32xbf16>
    %cst_106 = arith.constant dense<0.000000e+00> : vector<8x16xf32>
    %418 = tpu.matmul %417, %6, %cst_106 {dimension_numbers = #tpu.dot_dimension_numbers<[1], [0], [0], [1], [0, 0, 1, 1], [], []>} : vector<8x32xbf16>, vector<32x16xbf16>, vector<8x16xf32> -> vector<8x16xf32>
    %419 = vector.broadcast %14 : vector<1x16xf32> to vector<8x16xf32>
    %420 = arith.addf %418, %419 : vector<8x16xf32>
    %cst_107 = arith.constant dense<0xFF800000> : vector<8xf32>
    %421 = vector.multi_reduction <maximumf>, %420, %cst_107 [1] : vector<8x16xf32> to vector<8xf32>
    %422 = vector.shape_cast %421 : vector<8xf32> to vector<8x1xf32>
    %423 = vector.broadcast %422 : vector<8x1xf32> to vector<8x16xf32>
    %424 = arith.subf %420, %423 : vector<8x16xf32>
    %425 = math.exp %424 : vector<8x16xf32>
    %cst_108 = arith.constant dense<0.000000e+00> : vector<8xf32>
    %426 = vector.multi_reduction <add>, %425, %cst_108 [1] : vector<8x16xf32> to vector<8xf32>
    %427 = vector.shape_cast %426 : vector<8xf32> to vector<8x1xf32>
    %428 = math.log %427 : vector<8x1xf32>
    %429 = vector.broadcast %428 : vector<8x1xf32> to vector<8x16xf32>
    %430 = arith.subf %424, %429 : vector<8x16xf32>
    %431 = tpu.concatenate %430, %381, %416, %31 in 1 : vector<8x16xf32>, vector<8x10xf32>, vector<8x32xf32>, vector<8x70xf32> -> vector<8x128xf32>
    %c5 = arith.constant 5 : index
    %c0_109 = arith.constant 0 : index
    %c0_110 = arith.constant 0 : index
    %432 = vector.load %arg4[%c5, %c0_109, %c0_110] : memref<8x8x128xf32, #tpu.memory_space<vmem>>, vector<1x8x128xf32>
    %433 = vector.shape_cast %432 : vector<1x8x128xf32> to vector<8x128xf32>
    %434 = vector.shape_cast %431 : vector<8x128xf32> to vector<1x8x128xf32>
    tpu.vector_store %arg4[%c5, %c0_109, %c0_110], %434 {strides = array<i32>} : memref<8x8x128xf32, #tpu.memory_space<vmem>>, vector<1x8x128xf32>,
    %435 = arith.truncf %416 : vector<8x32xf32> to vector<8x32xbf16>
    %436 = vector.extract_strided_slice %27 {offsets = [48, 0], sizes = [8, 10], strides = [1, 1]} : vector<64x10xf32> to vector<8x10xf32>
    %cst_111 = arith.constant dense<0.000000e+00> : vector<8x10xf32>
    %437 = tpu.matmul %435, %2, %cst_111 {dimension_numbers = #tpu.dot_dimension_numbers<[1], [0], [0], [1], [0, 0, 1, 1], [], []>} : vector<8x32xbf16>, vector<32x10xbf16>, vector<8x10xf32> -> vector<8x10xf32>
    %438 = arith.addf %436, %437 : vector<8x10xf32>
    %cst_112 = arith.constant dense<0xFF800000> : vector<8xf32>
    %439 = vector.multi_reduction <maximumf>, %438, %cst_112 [1] : vector<8x10xf32> to vector<8xf32>
    %440 = vector.shape_cast %439 : vector<8xf32> to vector<8x1xf32>
    %441 = vector.broadcast %440 : vector<8x1xf32> to vector<8x10xf32>
    %442 = arith.subf %438, %441 : vector<8x10xf32>
    %443 = math.exp %442 : vector<8x10xf32>
    %cst_113 = arith.constant dense<0.000000e+00> : vector<8xf32>
    %444 = vector.multi_reduction <add>, %443, %cst_113 [1] : vector<8x10xf32> to vector<8xf32>
    %445 = vector.shape_cast %444 : vector<8xf32> to vector<8x1xf32>
    %446 = tpu.reciprocal %445 {approx = true} : vector<8x1xf32> -> vector<8x1xf32>
    %447 = vector.broadcast %446 : vector<8x1xf32> to vector<8x10xf32>
    %448 = arith.mulf %443, %447 : vector<8x10xf32>
    %449 = arith.truncf %448 : vector<8x10xf32> to vector<8x10xbf16>
    %cst_114 = arith.constant dense<0.000000e+00> : vector<8x32xf32>
    %450 = tpu.matmul %449, %15, %cst_114 {dimension_numbers = #tpu.dot_dimension_numbers<[1], [0], [0], [1], [0, 0, 1, 1], [], []>} : vector<8x10xbf16>, vector<10x32xbf16>, vector<8x32xf32> -> vector<8x32xf32>
    %451 = vector.extract_strided_slice %30 {offsets = [48, 0], sizes = [8, 32], strides = [1, 1]} : vector<64x32xf32> to vector<8x32xf32>
    %452 = arith.truncf %450 : vector<8x32xf32> to vector<8x32xbf16>
    %cst_115 = arith.constant dense<0.000000e+00> : vector<8x32xf32>
    %453 = tpu.matmul %452, %4, %cst_115 {dimension_numbers = #tpu.dot_dimension_numbers<[1], [0], [0], [1], [0, 0, 1, 1], [], []>} : vector<8x32xbf16>, vector<32x32xbf16>, vector<8x32xf32> -> vector<8x32xf32>
    %454 = arith.addf %451, %453 : vector<8x32xf32>
    %cst_116 = arith.constant 0.000000e+00 : f32
    %455 = vector.broadcast %cst_116 : f32 to vector<8x32xf32>
    %456 = arith.maximumf %454, %455 : vector<8x32xf32>
    %457 = arith.truncf %456 : vector<8x32xf32> to vector<8x32xbf16>
    %458 = tpu.concatenate %457, %435 in 1 : vector<8x32xbf16>, vector<8x32xbf16> -> vector<8x64xbf16>
    %cst_117 = arith.constant dense<0.000000e+00> : vector<8x128xf32>
    %459 = tpu.matmul %458, %5, %cst_117 {dimension_numbers = #tpu.dot_dimension_numbers<[1], [0], [0], [1], [0, 0, 1, 1], [], []>} : vector<8x64xbf16>, vector<64x128xbf16>, vector<8x128xf32> -> vector<8x128xf32>
    %460 = vector.broadcast %12 : vector<1x128xf32> to vector<8x128xf32>
    %461 = arith.addf %459, %460 : vector<8x128xf32>
    %462 = vector.extract_strided_slice %461 {offsets = [0, 0], sizes = [8, 32], strides = [1, 1]} : vector<8x128xf32> to vector<8x32xf32>
    %463 = arith.negf %462 : vector<8x32xf32>
    %464 = math.exp %463 : vector<8x32xf32>
    %cst_118 = arith.constant 1.000000e+00 : f32
    %465 = vector.broadcast %cst_118 : f32 to vector<8x32xf32>
    %466 = arith.addf %465, %464 : vector<8x32xf32>
    %467 = arith.divf %465, %466 : vector<8x32xf32>
    %468 = vector.extract_strided_slice %461 {offsets = [0, 32], sizes = [8, 32], strides = [1, 1]} : vector<8x128xf32> to vector<8x32xf32>
    %469 = arith.negf %468 : vector<8x32xf32>
    %470 = math.exp %469 : vector<8x32xf32>
    %cst_119 = arith.constant 1.000000e+00 : f32
    %471 = vector.broadcast %cst_119 : f32 to vector<8x32xf32>
    %472 = arith.addf %471, %470 : vector<8x32xf32>
    %473 = arith.divf %471, %472 : vector<8x32xf32>
    %474 = vector.extract_strided_slice %461 {offsets = [0, 64], sizes = [8, 32], strides = [1, 1]} : vector<8x128xf32> to vector<8x32xf32>
    %475 = vector.extract_strided_slice %461 {offsets = [0, 96], sizes = [8, 32], strides = [1, 1]} : vector<8x128xf32> to vector<8x32xf32>
    %476 = arith.mulf %467, %475 : vector<8x32xf32>
    %477 = arith.addf %474, %476 : vector<8x32xf32>
    %478 = math.tanh %477 : vector<8x32xf32>
    %cst_120 = arith.constant 1.000000e+00 : f32
    %479 = vector.broadcast %cst_120 : f32 to vector<8x32xf32>
    %480 = arith.subf %479, %473 : vector<8x32xf32>
    %481 = arith.mulf %480, %478 : vector<8x32xf32>
    %482 = arith.mulf %473, %416 : vector<8x32xf32>
    %483 = arith.addf %481, %482 : vector<8x32xf32>
    %484 = arith.truncf %483 : vector<8x32xf32> to vector<8x32xbf16>
    %cst_121 = arith.constant dense<0.000000e+00> : vector<8x16xf32>
    %485 = tpu.matmul %484, %6, %cst_121 {dimension_numbers = #tpu.dot_dimension_numbers<[1], [0], [0], [1], [0, 0, 1, 1], [], []>} : vector<8x32xbf16>, vector<32x16xbf16>, vector<8x16xf32> -> vector<8x16xf32>
    %486 = vector.broadcast %14 : vector<1x16xf32> to vector<8x16xf32>
    %487 = arith.addf %485, %486 : vector<8x16xf32>
    %cst_122 = arith.constant dense<0xFF800000> : vector<8xf32>
    %488 = vector.multi_reduction <maximumf>, %487, %cst_122 [1] : vector<8x16xf32> to vector<8xf32>
    %489 = vector.shape_cast %488 : vector<8xf32> to vector<8x1xf32>
    %490 = vector.broadcast %489 : vector<8x1xf32> to vector<8x16xf32>
    %491 = arith.subf %487, %490 : vector<8x16xf32>
    %492 = math.exp %491 : vector<8x16xf32>
    %cst_123 = arith.constant dense<0.000000e+00> : vector<8xf32>
    %493 = vector.multi_reduction <add>, %492, %cst_123 [1] : vector<8x16xf32> to vector<8xf32>
    %494 = vector.shape_cast %493 : vector<8xf32> to vector<8x1xf32>
    %495 = math.log %494 : vector<8x1xf32>
    %496 = vector.broadcast %495 : vector<8x1xf32> to vector<8x16xf32>
    %497 = arith.subf %491, %496 : vector<8x16xf32>
    %498 = tpu.concatenate %497, %448, %483, %31 in 1 : vector<8x16xf32>, vector<8x10xf32>, vector<8x32xf32>, vector<8x70xf32> -> vector<8x128xf32>
    %c6 = arith.constant 6 : index
    %c0_124 = arith.constant 0 : index
    %c0_125 = arith.constant 0 : index
    %499 = vector.load %arg4[%c6, %c0_124, %c0_125] : memref<8x8x128xf32, #tpu.memory_space<vmem>>, vector<1x8x128xf32>
    %500 = vector.shape_cast %499 : vector<1x8x128xf32> to vector<8x128xf32>
    %501 = vector.shape_cast %498 : vector<8x128xf32> to vector<1x8x128xf32>
    tpu.vector_store %arg4[%c6, %c0_124, %c0_125], %501 {strides = array<i32>} : memref<8x8x128xf32, #tpu.memory_space<vmem>>, vector<1x8x128xf32>,
    %502 = arith.truncf %483 : vector<8x32xf32> to vector<8x32xbf16>
    %503 = vector.extract_strided_slice %27 {offsets = [56, 0], sizes = [8, 10], strides = [1, 1]} : vector<64x10xf32> to vector<8x10xf32>
    %cst_126 = arith.constant dense<0.000000e+00> : vector<8x10xf32>
    %504 = tpu.matmul %502, %2, %cst_126 {dimension_numbers = #tpu.dot_dimension_numbers<[1], [0], [0], [1], [0, 0, 1, 1], [], []>} : vector<8x32xbf16>, vector<32x10xbf16>, vector<8x10xf32> -> vector<8x10xf32>
    %505 = arith.addf %503, %504 : vector<8x10xf32>
    %cst_127 = arith.constant dense<0xFF800000> : vector<8xf32>
    %506 = vector.multi_reduction <maximumf>, %505, %cst_127 [1] : vector<8x10xf32> to vector<8xf32>
    %507 = vector.shape_cast %506 : vector<8xf32> to vector<8x1xf32>
    %508 = vector.broadcast %507 : vector<8x1xf32> to vector<8x10xf32>
    %509 = arith.subf %505, %508 : vector<8x10xf32>
    %510 = math.exp %509 : vector<8x10xf32>
    %cst_128 = arith.constant dense<0.000000e+00> : vector<8xf32>
    %511 = vector.multi_reduction <add>, %510, %cst_128 [1] : vector<8x10xf32> to vector<8xf32>
    %512 = vector.shape_cast %511 : vector<8xf32> to vector<8x1xf32>
    %513 = tpu.reciprocal %512 {approx = true} : vector<8x1xf32> -> vector<8x1xf32>
    %514 = vector.broadcast %513 : vector<8x1xf32> to vector<8x10xf32>
    %515 = arith.mulf %510, %514 : vector<8x10xf32>
    %516 = arith.truncf %515 : vector<8x10xf32> to vector<8x10xbf16>
    %cst_129 = arith.constant dense<0.000000e+00> : vector<8x32xf32>
    %517 = tpu.matmul %516, %15, %cst_129 {dimension_numbers = #tpu.dot_dimension_numbers<[1], [0], [0], [1], [0, 0, 1, 1], [], []>} : vector<8x10xbf16>, vector<10x32xbf16>, vector<8x32xf32> -> vector<8x32xf32>
    %518 = vector.extract_strided_slice %30 {offsets = [56, 0], sizes = [8, 32], strides = [1, 1]} : vector<64x32xf32> to vector<8x32xf32>
    %519 = arith.truncf %517 : vector<8x32xf32> to vector<8x32xbf16>
    %cst_130 = arith.constant dense<0.000000e+00> : vector<8x32xf32>
    %520 = tpu.matmul %519, %4, %cst_130 {dimension_numbers = #tpu.dot_dimension_numbers<[1], [0], [0], [1], [0, 0, 1, 1], [], []>} : vector<8x32xbf16>, vector<32x32xbf16>, vector<8x32xf32> -> vector<8x32xf32>
    %521 = arith.addf %518, %520 : vector<8x32xf32>
    %cst_131 = arith.constant 0.000000e+00 : f32
    %522 = vector.broadcast %cst_131 : f32 to vector<8x32xf32>
    %523 = arith.maximumf %521, %522 : vector<8x32xf32>
    %524 = arith.truncf %523 : vector<8x32xf32> to vector<8x32xbf16>
    %525 = tpu.concatenate %524, %502 in 1 : vector<8x32xbf16>, vector<8x32xbf16> -> vector<8x64xbf16>
    %cst_132 = arith.constant dense<0.000000e+00> : vector<8x128xf32>
    %526 = tpu.matmul %525, %5, %cst_132 {dimension_numbers = #tpu.dot_dimension_numbers<[1], [0], [0], [1], [0, 0, 1, 1], [], []>} : vector<8x64xbf16>, vector<64x128xbf16>, vector<8x128xf32> -> vector<8x128xf32>
    %527 = vector.broadcast %12 : vector<1x128xf32> to vector<8x128xf32>
    %528 = arith.addf %526, %527 : vector<8x128xf32>
    %529 = vector.extract_strided_slice %528 {offsets = [0, 0], sizes = [8, 32], strides = [1, 1]} : vector<8x128xf32> to vector<8x32xf32>
    %530 = arith.negf %529 : vector<8x32xf32>
    %531 = math.exp %530 : vector<8x32xf32>
    %cst_133 = arith.constant 1.000000e+00 : f32
    %532 = vector.broadcast %cst_133 : f32 to vector<8x32xf32>
    %533 = arith.addf %532, %531 : vector<8x32xf32>
    %534 = arith.divf %532, %533 : vector<8x32xf32>
    %535 = vector.extract_strided_slice %528 {offsets = [0, 32], sizes = [8, 32], strides = [1, 1]} : vector<8x128xf32> to vector<8x32xf32>
    %536 = arith.negf %535 : vector<8x32xf32>
    %537 = math.exp %536 : vector<8x32xf32>
    %cst_134 = arith.constant 1.000000e+00 : f32
    %538 = vector.broadcast %cst_134 : f32 to vector<8x32xf32>
    %539 = arith.addf %538, %537 : vector<8x32xf32>
    %540 = arith.divf %538, %539 : vector<8x32xf32>
    %541 = vector.extract_strided_slice %528 {offsets = [0, 64], sizes = [8, 32], strides = [1, 1]} : vector<8x128xf32> to vector<8x32xf32>
    %542 = vector.extract_strided_slice %528 {offsets = [0, 96], sizes = [8, 32], strides = [1, 1]} : vector<8x128xf32> to vector<8x32xf32>
    %543 = arith.mulf %534, %542 : vector<8x32xf32>
    %544 = arith.addf %541, %543 : vector<8x32xf32>
    %545 = math.tanh %544 : vector<8x32xf32>
    %cst_135 = arith.constant 1.000000e+00 : f32
    %546 = vector.broadcast %cst_135 : f32 to vector<8x32xf32>
    %547 = arith.subf %546, %540 : vector<8x32xf32>
    %548 = arith.mulf %547, %545 : vector<8x32xf32>
    %549 = arith.mulf %540, %483 : vector<8x32xf32>
    %550 = arith.addf %548, %549 : vector<8x32xf32>
    %551 = arith.truncf %550 : vector<8x32xf32> to vector<8x32xbf16>
    %cst_136 = arith.constant dense<0.000000e+00> : vector<8x16xf32>
    %552 = tpu.matmul %551, %6, %cst_136 {dimension_numbers = #tpu.dot_dimension_numbers<[1], [0], [0], [1], [0, 0, 1, 1], [], []>} : vector<8x32xbf16>, vector<32x16xbf16>, vector<8x16xf32> -> vector<8x16xf32>
    %553 = vector.broadcast %14 : vector<1x16xf32> to vector<8x16xf32>
    %554 = arith.addf %552, %553 : vector<8x16xf32>
    %cst_137 = arith.constant dense<0xFF800000> : vector<8xf32>
    %555 = vector.multi_reduction <maximumf>, %554, %cst_137 [1] : vector<8x16xf32> to vector<8xf32>
    %556 = vector.shape_cast %555 : vector<8xf32> to vector<8x1xf32>
    %557 = vector.broadcast %556 : vector<8x1xf32> to vector<8x16xf32>
    %558 = arith.subf %554, %557 : vector<8x16xf32>
    %559 = math.exp %558 : vector<8x16xf32>
    %cst_138 = arith.constant dense<0.000000e+00> : vector<8xf32>
    %560 = vector.multi_reduction <add>, %559, %cst_138 [1] : vector<8x16xf32> to vector<8xf32>
    %561 = vector.shape_cast %560 : vector<8xf32> to vector<8x1xf32>
    %562 = math.log %561 : vector<8x1xf32>
    %563 = vector.broadcast %562 : vector<8x1xf32> to vector<8x16xf32>
    %564 = arith.subf %558, %563 : vector<8x16xf32>
    %565 = tpu.concatenate %564, %515, %550, %31 in 1 : vector<8x16xf32>, vector<8x10xf32>, vector<8x32xf32>, vector<8x70xf32> -> vector<8x128xf32>
    %c7 = arith.constant 7 : index
    %c0_139 = arith.constant 0 : index
    %c0_140 = arith.constant 0 : index
    %566 = vector.load %arg4[%c7, %c0_139, %c0_140] : memref<8x8x128xf32, #tpu.memory_space<vmem>>, vector<1x8x128xf32>
    %567 = vector.shape_cast %566 : vector<1x8x128xf32> to vector<8x128xf32>
    %568 = vector.shape_cast %565 : vector<8x128xf32> to vector<1x8x128xf32>
    tpu.vector_store %arg4[%c7, %c0_139, %c0_140], %568 {strides = array<i32>} : memref<8x8x128xf32, #tpu.memory_space<vmem>>, vector<1x8x128xf32>,
    return
  }
}

</mosaic_0001>

<bundles_post_ra>
// kernel: attn_decoder_decode.1
= control target key start
LH: loop header
LB: loop body
LE: loop exit
PB: predicated region body
PF: predicated region fallthrough
CT: control target
= control target key end

     0   :  { %v3513_v0 = vmov 0   ;;  %v66_v12 = vlaneseq  ;;  %vm126_vm4 = vcmask 130048   ;;  %v3514_v18 = vmov 0.0   ;;  %s3516_s30 = smov 32   ;;  %s3517_s12 = smov 64   ;;  %s4423_s0 = inlined_call_operand.vmem [shape: s32[64,1], index: 0, kind: input, shape index: {}]   ;;  %s4424_s3 = inlined_call_operand.vmem [shape: bf16[304,128], index: 3, kind: input, shape index: {}]   ;;  %s4425_s1 = inlined_call_operand.vmem [shape: f32[8,32], index: 1, kind: input, shape index: {}]   ;;  %s4426_s2 = inlined_call_operand.vmem [shape: bf16[16,128], index: 2, kind: input, shape index: {}]   ;;  %s4427_s4 = inlined_call_operand.vmem [shape: f32[8,8,128], index: 4, kind: output, shape index: {}]  }
   0x1   :  { %3374 = vset.pattern.permute.xlu1 %v3513_v0  ;;  %3373 = vset.pattern.permute.xlu0 %v3513_v0  ;;  %v60_v1 = vld [vmem:[%s4423_s0 + $0x10] sm:$0xff]  ;;  %v58_v2 = vld [vmem:[%s4423_s0] sm:$0xff]  ;;  %v61_v3 = vld [vmem:[%s4423_s0 + $0x18] sm:$0xff]  ;;  %vm224_vm9 = vcmask 261120   ;;  %vm3515_vm10 = vmmov 0   ;;  %vm441_vm11 = vcmask 80896  }
   0x2   :  { %75 = vperm.xlu1 %3374, %v60_v1   ;;  %69 = vperm.xlu0 %3373, %v58_v2   ;;  %v59_v4 = vld [vmem:[%s4423_s0 + $0x8] sm:$0xff]  ;;  %v62_v6 = vld [vmem:[%s4423_s0 + $0x20] sm:$0xff]  ;;  %v65_v8 = vld [vmem:[%s4423_s0 + $0x38] sm:$0xff]  ;;  %v67_v13 = vand.u32 127, %v66_v12  ;;  %v209_v53 = vshrl.u32 %v66_v12, 7  ;;  %vm462_vm12 = vcmask 1044480  }
   0x3   :  { %v63_v5 = vld [vmem:[%s4423_s0 + $0x28] sm:$0xff]  ;;  %v3375_v7 = vld [vmem:[%s4424_s3] sm:$0xff]   ;;  %v64_v9 = vld [vmem:[%s4423_s0 + $0x30] sm:$0xff]  ;;  %vm599_vm13 = vcmask 523264   ;;  %s3518_s17 = smov 96   ;;  %vm755_vm14 = vcmask 211968  }
   0x4   :  { %2995 = vmatprep.subr.bf16.mxu0 %v3375_v7  ;;  %v3376_v10 = vld [vmem:[%s4424_s3 + $0x8] sm:$0xff]   ;;  %v3378_v35 = vld [vmem:[%s4424_s3 + $0x10] sm:$0xff]   ;;  %v3603_v43 = vld [vmem:[%s4424_s3 + $0x18] sm:$0xff]   ;;  %v3646_v56 = vsub.s32 0, %v209_v53  ;;  %vm757_vm15 = vcmask 474112  }
   0x5   :  { %2996 = vmatpush3.bf16.msra.mxu0 %v3375_v7  ;;  %v3377_v11 = vld [vmem:[%s4424_s3 + $0x28] sm:$0xff]   ;;  %3005 = vmatprep.subr.bf16.mxu1 %v3376_v10  ;;  %v3379_v36 = vld [vmem:[%s4424_s3 + $0x30] sm:$0xff]   ;;  %v3613_v45 = vld [vmem:[%s4424_s3 + $0x20] sm:$0xff]  }
   0x6   :  { %78 = vperm.xlu1 %3374, %v61_v3   ;;  %72 = vperm.xlu0 %3373, %v59_v4   ;;  %v3627_v51 = vld [vmem:[%s4425_s1] sm:$0xff]  ;;  %v48_v54 = vld [vmem:[%s4424_s3 + $0x78] sm:$0x1]  ;;  %v3730_v53 = vld [vmem:[%s4424_s3 + $0x50] sm:$0xff]  }
   0x7   :  { %3017 = vmatprep.subr.bf16.mxu0 %v3377_v11  ;;  %3006 = vmatpush3.bf16.msra.mxu1 %v3376_v10  ;;  %v3633_v52 = vpack.c.bf16 %v3627_v51, %v3627_v51  ;;  %v50_v55 = vld [vmem:[%s4424_s3 + $0x80] sm:$0x1]  ;;  %v49_v57 = vunpack.c.l.bf16 %v48_v54 }
   0x8   :  { %3007 = vmatprep.subr.bf16.mxu1 %v3378_v35  ;;  %v51_v58 = vunpack.c.l.bf16 %v50_v55 }
   0x9   :  { %v211_v59 = vrot.slane %v49_v57, %v3646_v56 }
   0xa   :  { %84 = vperm.xlu1 %3374, %v63_v5   ;;  %81 = vperm.xlu0 %3373, %v62_v6   ;;  %v3650_v60 = vrot.slane %v51_v58, %v3646_v56 }
   0xb   :  { %3008 = vmatpush3.bf16.msra.mxu1 %v3378_v35 }
   0xc   :  { %3029 = vmatprep.subr.bf16.mxu1 %v3514_v18 }
   0xe   :  { %90 = vperm.xlu1 %3374, %v65_v8   ;;  %87 = vperm.xlu0 %3373, %v64_v9  }
  0x81   :  { %v76_v14 = vpop.permute.xlu1 %75  ;;  %v70_v15 = vpop.permute.xlu0 %69 }
  0x82   :  { %vm94_vm0 = vcmp.eq.s32.totalorder %v76_v14, %v67_v13  ;;  %vm92_vm1 = vcmp.eq.s32.totalorder %v70_v15, %v67_v13 }
  0x83   :  { %v2761_v19 = vsel %vm94_vm0, 1.0, %v3514_v18  ;;  %v2759_v20 = vsel %vm92_vm1, 1.0, %v3514_v18 }
  0x85   :  { %v79_v16 = vpop.permute.xlu1 %78  ;;  %v73_v17 = vpop.permute.xlu0 %72 }
  0x86   :  { %vm95_vm2 = vcmp.eq.s32.totalorder %v79_v16, %v67_v13  ;;  %vm93_vm3 = vcmp.eq.s32.totalorder %v73_v17, %v67_v13 }
  0x87   :  { %v2762_v21 = vsel %vm95_vm2, 1.0, %v3514_v18  ;;  %v2760_v22 = vsel %vm93_vm3, 1.0, %v3514_v18 }
  0x88   :  { %v117_v23 = vpack.c.bf16 %v2762_v21, %v2761_v19  ;;  %v116_v24 = vpack.c.bf16 %v2760_v22, %v2759_v20 }
  0x89   :  { %v85_v25 = vpop.permute.xlu1 %84  ;;  %v82_v26 = vpop.permute.xlu0 %81 }
  0x8a   :  { %vm97_vm5 = vcmp.eq.s32.totalorder %v85_v25, %v67_v13  ;;  %vm96_vm6 = vcmp.eq.s32.totalorder %v82_v26, %v67_v13  ;;  %2997 = vmatprep.mubr.msk.bf16.mxu0 %vm126_vm4, %v116_v24 }
  0x8b   :  { %v2764_v27 = vsel %vm97_vm5, 1.0, %v3514_v18  ;;  %v2763_v28 = vsel %vm96_vm6, 1.0, %v3514_v18  ;;  %2998 = vmatmul.mubr.msk.bf16.vlgmr.msra.gmra.mrb[0].mxu0 %vm126_vm4, %v117_v23 }
  0x8c   :  { %v118_v29 = vpack.c.bf16 %v2764_v27, %v2763_v28  ;;  %3018 = vmatpush3.bf16.msra.mxu0 %v3377_v11 }
  0x8d   :  { %v91_v30 = vpop.permute.xlu1 %90  ;;  %v88_v31 = vpop.permute.xlu0 %87  ;;  %3019 = vmatprep.subr.bf16.mxu0 %v3379_v36 }
  0x8e   :  { %vm99_vm7 = vcmp.eq.s32.totalorder %v91_v30, %v67_v13  ;;  %vm98_vm8 = vcmp.eq.s32.totalorder %v88_v31, %v67_v13  ;;  %3001 = vmatprep.mubr.msk.bf16.mxu0 %vm126_vm4, %v118_v29 }
  0x8f   :  { %v2766_v32 = vsel %vm99_vm7, 1.0, %v3514_v18  ;;  %v2765_v33 = vsel %vm98_vm8, 1.0, %v3514_v18 }
  0x90   :  { %v119_v34 = vpack.c.bf16 %v2766_v32, %v2765_v33  ;;  %3020 = vmatpush3.bf16.msra.mxu0 %v3379_v36 }
  0x91   :  { %3043 = vmatprep.subr.bf16.mxu0 %v3514_v18 }
  0x93   :  { %3002 = vmatmul.mubr.msk.bf16.gmra.mrb[4].mxu0 %vm126_vm4, %v119_v34 }
 0x15e   :  { %v2999_v37 = vpop.f32.mrb[0].mxu0 }
 0x15f   :  { %v173_v38 = vpop.f32.mrb[1].mxu0 }
 0x160   :  { %v3000_v39 = vpop.f32.mrb[2].mxu0 }
 0x161   :  { %v205_v40 = vpack.c.bf16 %v3000_v39, %v2999_v37  ;;  %v176_v41 = vpop.f32.mrb[3].mxu0 }
 0x162   :  { %v204_v42 = vpack.c.bf16 %v176_v41, %v173_v38 }
 0x164   :  { %3009 = vmatprep.mubr.msk.bf16.mxu1 %vm224_vm9, %v204_v42  ;;  %3021 = vmatprep.mubr.msk.bf16.mxu0 %vm224_vm9, %v204_v42  ;;  %v3701_v42 = vld [vmem:[%s4424_s3 + $0x38] sm:$0xff]  }
 0x165   :  { %3010 = vmatmul.mubr.msk.bf16.vlgmr.msra.gmra.mrb[0].mxu1 %vm224_vm9, %v205_v40  ;;  %3022 = vmatmul.mubr.msk.bf16.vlgmr.msra.gmra.mrb[8].mxu0 %vm224_vm9, %v205_v40  ;;  %v3382_v40 = vld [vmem:[%s4426_s2] sm:$0x1f]  }
 0x166   :  { %3030 = vmatpush3.bf16.msra.mxu1 %v3603_v43  ;;  %v3003_v44 = vpop.f32.mrb[4].mxu0  ;;  %v3694_v41 = vsel %vm462_vm12, %v3382_v40, 0  ;;  %3044 = vmatpush3.bf16.msra.mxu0 %v3701_v42 }
 0x167   :  { %v189_v46 = vpop.f32.mrb[5].mxu0  ;;  %3031 = vmatprep.subr.bf16.mxu1 %v3514_v18  ;;  %3045 = vmatprep.subr.bf16.mxu0 %v3514_v18 }
 0x168   :  { %v3004_v47 = vpop.f32.mrb[6].mxu0 }
 0x169   :  { %v207_v48 = vpack.c.bf16 %v3004_v47, %v3003_v44  ;;  %v192_v49 = vpop.f32.mrb[7].mxu0  ;;  %v3707_v44 = vld [vmem:[%s4424_s3 + $0x40] sm:$0xff]  }
 0x16a   :  { %v206_v50 = vpack.c.bf16 %v192_v49, %v189_v46  ;;  %3032 = vmatpush3.bf16.msra.mxu1 %v3613_v45  ;;  %3046 = vmatpush3.bf16.msra.mxu0 %v3707_v44 }
 0x16b   :  { %3037 = vmatprep.subr.bf16.mxu1 %v3514_v18  ;;  %3063 = vmatprep.subr.bf16.mxu0 %v3514_v18 }
 0x16c   :  { %3013 = vmatprep.mubr.msk.bf16.mxu1 %vm224_vm9, %v206_v50  ;;  %3025 = vmatprep.mubr.msk.bf16.mxu0 %vm224_vm9, %v206_v50  ;;  %v3722_v50 = vld [vmem:[%s4424_s3 + $0x48] sm:$0xff]  }
 0x16d   :  { %3014 = vmatmul.mubr.msk.bf16.gmra.mrb[4].mxu1 %vm224_vm9, %v207_v48  ;;  %3026 = vmatmul.mubr.msk.bf16.gmra.mrb[12].mxu0 %vm224_vm9, %v207_v48 }
 0x16e   :  { %3033 = vmatprep.mubr.msk.bf16.mxu1 %vm3515_vm10, %v3514_v18  ;;  %3047 = vmatprep.mubr.msk.bf16.mxu0 %vm3515_vm10, %v3514_v18 }
 0x175   :  { %3034 = vmatmul.mubr.msk.bf16.vlgmr.msra.gmra.mrb[8].mxu1 %vm224_vm9, %v3633_v52 }
 0x176   :  { %3039 = vmatprep.mubr.msk.bf16.mxu1 %vm3515_vm10, %v3514_v18  ;;  %3038 = vmatpush3.bf16.msra.mxu1 %v3694_v41 }
 0x177   :  { %3051 = vmatprep.subr.bf16.mxu1 %v3514_v18 }
 0x238   :  { %v3011_v61 = vpop.f32.mrb[0].mxu1  ;;  %v3023_v62 = vpop.f32.mrb[8].mxu0 }
 0x239   :  { %v3652_v63 = vadd.f32 %v3011_v61, %v211_v59  ;;  %v3655_v0 = vadd.f32 %v3023_v62, %v3650_v60  ;;  %v271_v1 = vpop.f32.mrb[1].mxu1  ;;  %v3657_v2 = vpop.f32.mrb[9].mxu0  ;;  %v3748_v61 = vld [vmem:[%s4424_s3 + $0x60] sm:$0xff]  }
 0x23a   :  { %v3012_v3 = vpop.f32.mrb[2].mxu1  ;;  %v3024_v4 = vpop.f32.mrb[10].mxu0  ;;  %v272_v28 = vadd.f32 %v271_v1, %v211_v59  ;;  %v353_v62 = vadd.f32 %v3657_v2, %v3650_v60 }
 0x23b   :  { %v3659_v5 = vadd.f32 %v3012_v3, %v211_v59  ;;  %v3662_v6 = vadd.f32 %v3024_v4, %v3650_v60  ;;  %v274_v7 = vpop.f32.mrb[3].mxu1  ;;  %v355_v8 = vpop.f32.mrb[11].mxu0 }
 0x23c   :  { %v3664_v9 = vadd.f32 %v274_v7, %v211_v59  ;;  %v3667_v10 = vadd.f32 %v355_v8, %v3650_v60 }
 0x240   :  { %v3015_v11 = vpop.f32.mrb[4].mxu1  ;;  %v3027_v12 = vpop.f32.mrb[12].mxu0 }
 0x241   :  { %v3669_v13 = vadd.f32 %v3015_v11, %v211_v59  ;;  %v3672_v14 = vadd.f32 %v3027_v12, %v3650_v60  ;;  %v287_v15 = vpop.f32.mrb[5].mxu1  ;;  %v368_v16 = vpop.f32.mrb[13].mxu0 }
 0x242   :  { %v3674_v17 = vadd.f32 %v287_v15, %v211_v59  ;;  %v3677_v19 = vadd.f32 %v368_v16, %v3650_v60  ;;  %v3016_v20 = vpop.f32.mrb[6].mxu1  ;;  %v3028_v21 = vpop.f32.mrb[14].mxu0 }
 0x243   :  { %v3679_v22 = vadd.f32 %v3016_v20, %v211_v59  ;;  %v3682_v23 = vadd.f32 %v3028_v21, %v3650_v60  ;;  %v290_v24 = vpop.f32.mrb[7].mxu1  ;;  %v371_v25 = vpop.f32.mrb[15].mxu0 }
 0x244   :  { %v3684_v26 = vadd.f32 %v290_v24, %v211_v59  ;;  %v3687_v27 = vadd.f32 %v371_v25, %v3650_v60  ;;  %v52_v60 = vld [vmem:[%s4424_s3 + $0x88] sm:$0x1] }
 0x245   :  { %v53_v2 = vunpack.c.l.bf16 %v52_v60 }
 0x247   :  { %v3764_v20 = vrot.slane %v53_v2, %v3646_v56 }
 0x248   :  { %v434_v29 = vpop.f32.mrb[8].mxu1 }
 0x249   :  { %v440_v30 = vadd.f32 %v434_v29, %v272_v28  ;;  %v3035_v31 = vpop.f32.mrb[9].mxu1 }
 0x24a   :  { %v437_v32 = vpop.f32.mrb[10].mxu1 }
 0x24b   :  { %v3036_v33 = vpop.f32.mrb[11].mxu1  ;;  %v442_v34 = vsel %vm441_vm11, %v440_v30, -inf }
 0x24c   :  { %443 = vmax.xlane.f32.xlu0 %v442_v34 }
 0x262   :  { %566 = vrot.lane.b32.xlu0 %v3633_v52, %s3516_s30  ;;  %v3741_v52 = vld [vmem:[%s4424_s3 + $0x58] sm:$0xff]  }
 0x2d9   :  { %v444_v35 = vpop.xlane.xlu0 %443 }
 0x2da   :  { %v445_v36 = vsub.f32 %v440_v30, %v444_v35 }
 0x2dc   :  { %v446_v37 = vmul.f32 1.442695, %v445_v36 }
 0x2dd   :  { %v567_v12 = vpop.permute.xlu0 %566 }
 0x2de   :  { %3391 = vpow2.f32 %v446_v37 }
 0x2e8   :  { %v3392_v38 = vpop.eup %3391 }
 0x2e9   :  { %v448_v39 = vsel %vm441_vm11, %v3392_v38, 0.0 }
 0x2ea   :  { %449 = vadd.xlane.f32.xlu1 %v448_v39  ;;  %v3780_v39 = vld [vmem:[%s4424_s3 + $0x70] sm:$0xff]  }
 0x377   :  { %v450_v46 = vpop.xlane.xlu1 %449 }
 0x378   :  { %3393 = vrcp.f32 %v450_v46 }
 0x382   :  { %v3394_v47 = vpop.eup %3393 }
 0x383   :  { %v3712_v48 = vmul.f32 %v3394_v47, %v3392_v38  ;;  %v3774_v38 = vld [vmem:[%s4424_s3 + $0x68] sm:$0xff]  }
 0x385   :  { %v453_v49 = vpack.c.bf16 %v3712_v48, %v3712_v48 }
 0x387   :  { %3040 = vmatmul.mubr.msk.bf16.vlgmr.msra.gmra.mrb[12].mxu1 %vm441_vm11, %v453_v49 }
 0x388   :  { %3059 = vmatprep.mubr.msk.bf16.mxu1 %vm3515_vm10, %v3514_v18  ;;  %3052 = vmatpush3.bf16.msra.mxu1 %v3722_v50 }
 0x389   :  { %3053 = vmatprep.subr.bf16.mxu1 %v3514_v18 }
 0x38c   :  { %3054 = vmatpush3.bf16.msra.mxu1 %v3730_v53 }
 0x38d   :  { %3055 = vmatprep.subr.bf16.mxu1 %v3514_v18 }
 0x390   :  { %3056 = vmatpush3.bf16.msra.mxu1 %v3741_v52 }
 0x391   :  { %3057 = vmatprep.subr.bf16.mxu1 %v3514_v18 }
 0x394   :  { %3058 = vmatpush3.bf16.msra.mxu1 %v3748_v61 }
 0x395   :  { %3079 = vmatprep.subr.bf16.mxu1 %v3514_v18 }
 0x45a   :  { %v500_v54 = vpop.f32.mrb[12].mxu1 }
 0x45b   :  { %v506_v55 = vpack.c.bf16 %v500_v54, %v500_v54  ;;  %v3041_v57 = vpop.f32.mrb[13].mxu1 }
 0x45c   :  { %v503_v58 = vpop.f32.mrb[14].mxu1 }
 0x45d   :  { %v3042_v59 = vpop.f32.mrb[15].mxu1  ;;  %3048 = vmatmul.mubr.msk.bf16.vlgmr.msra.gmra.mrb[16].mxu0 %vm224_vm9, %v506_v55 }
 0x45e   :  { %3067 = vmatprep.mubr.msk.bf16.mxu0 %vm3515_vm10, %v3514_v18  ;;  %3064 = vmatpush3.bf16.msra.mxu0 %v3774_v38 }
 0x45f   :  { %3065 = vmatprep.subr.bf16.mxu0 %v3514_v18 }
 0x462   :  { %3066 = vmatpush3.bf16.msra.mxu0 %v3780_v39 }
 0x463   :  { %3071 = vmatprep.subr.bf16.mxu0 %v3514_v18 }
 0x530   :  { %v556_v1 = vpop.f32.mrb[16].mxu0 }
 0x531   :  { %v562_v3 = vadd.f32 %v556_v1, %v353_v62  ;;  %v3049_v4 = vpop.f32.mrb[17].mxu0 }
 0x532   :  { %v559_v7 = vpop.f32.mrb[18].mxu0 }
 0x533   :  { %v563_v8 = vmax.f32 %v562_v3, 0.0  ;;  %v3050_v11 = vpop.f32.mrb[19].mxu0 }
 0x535   :  { %v564_v15 = vpack.c.bf16 %v563_v8, %v563_v8 }
 0x537   :  { %v570_v16 = vsel %vm224_vm9, %v564_v15, %v567_v12 }
 0x538   :  { %3060 = vmatmul.mubr.msk.bf16.vlgmr.msra.gmra.mrb[16].mxu1 %vm599_vm13, %v570_v16 }
 0x539   :  { %3080 = vmatpush3.bf16.msra.mxu1 %v3694_v41  ;;  %3081 = vmatprep.mubr.msk.bf16.mxu1 %vm3515_vm10, %v3514_v18 }
 0x53a   :  { %3093 = vmatprep.subr.bf16.mxu1 %v3514_v18 }
 0x60b   :  { %v636_v21 = vpop.f32.mrb[16].mxu1 }
 0x60c   :  { %v637_v24 = vadd.f32 %v636_v21, %v3764_v20  ;;  %v3061_v25 = vpop.f32.mrb[17].mxu1 }
 0x60d   :  { %v639_v28 = vpop.f32.mrb[18].mxu1 }
 0x60e   :  { %649 = vrot.lane.b32.xlu1 %v637_v24, %s3516_s30  ;;  %v3062_v29 = vpop.f32.mrb[19].mxu1  ;;  %v2797_v30 = vmul.f32 -1.442695, %v637_v24 }
 0x610   :  { %3395 = vpow2.f32 %v2797_v30 }
 0x61a   :  { %v3396_v31 = vpop.eup %3395 }
 0x61b   :  { %v645_v32 = vadd.f32 1.0, %v3396_v31 }
 0x61d   :  { %3397 = vrcp.f32 %v645_v32 }
 0x627   :  { %v3398_v33 = vpop.eup %3397 }
 0x628   :  { %v659_v46 = vsub.f32 1.0, %v3398_v33 }
 0x680   :  { %v650_v34 = vpop.permute.xlu1 %649 }
 0x681   :  { %v652_v35 = vmul.f32 %v3398_v33, %v650_v34 }
 0x683   :  { %654 = vrot.lane.b32.xlu0 %v652_v35, %s3517_s12 }
 0x687   :  { %666 = vrot.lane.b32.xlu0 %v3627_v51, %s3516_s30 }
 0x6f5   :  { %v655_v36 = vpop.permute.xlu0 %654 }
 0x6f6   :  { %v657_v37 = vadd.f32 %v655_v36, %v637_v24 }
 0x6f8   :  { %3399 = vtanh.f32 %v657_v37 }
 0x6f9   :  { %v667_v51 = vpop.permute.xlu0 %666 }
 0x6fa   :  { %v669_v49 = vmul.f32 %v3398_v33, %v667_v51 }
 0x702   :  { %v3400_v40 = vpop.eup %3399 }
 0x703   :  { %661 = vrot.lane.b32.xlu1 %v3400_v40, %s3518_s17 }
 0x775   :  { %v662_v47 = vpop.permute.xlu1 %661 }
 0x776   :  { %v664_v54 = vmul.f32 %v662_v47, %v659_v46 }
 0x778   :  { %v3786_v55 = vadd.f32 %v669_v49, %v664_v54 }
 0x77a   :  { %v3790_v57 = vpack.c.bf16 %v3786_v55, %v3786_v55 }
 0x77c   :  { %677 = vrot.lane.b32.xlu1 %v3790_v57, %s3518_s17 }
 0x7ee   :  { %v678_v58 = vpop.permute.xlu1 %677 }
 0x7ef   :  { %3068 = vmatmul.mubr.msk.bf16.vlgmr.msra.gmra.mrb[20].mxu0 %vm224_vm9, %v678_v58 }
 0x7f0   :  { %3072 = vmatpush3.bf16.msra.mxu0 %v3603_v43  ;;  %3075 = vmatprep.mubr.msk.bf16.mxu0 %vm3515_vm10, %v3514_v18 }
 0x7f1   :  { %3073 = vmatprep.subr.bf16.mxu0 %v3514_v18 }
 0x7f4   :  { %3074 = vmatpush3.bf16.msra.mxu0 %v3613_v45 }
 0x7f5   :  { %3085 = vmatprep.subr.bf16.mxu0 %v3514_v18 }
 0x7f7   :  { %3076 = vmatmul.mubr.msk.bf16.vlgmr.msra.gmra.mrb[24].mxu0 %vm224_vm9, %v678_v58 }
 0x7f8   :  { %3086 = vmatpush3.bf16.msra.mxu0 %v3701_v42  ;;  %3089 = vmatprep.mubr.msk.bf16.mxu0 %vm3515_vm10, %v3514_v18 }
 0x7f9   :  { %3087 = vmatprep.subr.bf16.mxu0 %v3514_v18 }
 0x7fc   :  { %3088 = vmatpush3.bf16.msra.mxu0 %v3707_v44 }
 0x7fd   :  { %3105 = vmatprep.subr.bf16.mxu0 %v3514_v18 }
 0x8c2   :  { %v3808_v59 = vpop.f32.mrb[20].mxu0 }
 0x8c3   :  { %v3069_v62 = vpop.f32.mrb[21].mxu0 }
 0x8c4   :  { %v731_v1 = vpop.f32.mrb[22].mxu0 }
 0x8c5   :  { %v3070_v3 = vpop.f32.mrb[23].mxu0 }
 0x8ca   :  { %v794_v4 = vpop.f32.mrb[24].mxu0 }
 0x8cb   :  { %v800_v7 = vadd.f32 %v794_v4, %v3664_v9  ;;  %v3077_v8 = vpop.f32.mrb[25].mxu0 }
 0x8cc   :  { %v797_v11 = vpop.f32.mrb[26].mxu0 }
 0x8cd   :  { %v3078_v12 = vpop.f32.mrb[27].mxu0  ;;  %v801_v15 = vsel %vm441_vm11, %v800_v7, -inf }
 0x8ce   :  { %802 = vmax.xlane.f32.xlu0 %v801_v15 }
 0x95b   :  { %v803_v16 = vpop.xlane.xlu0 %802 }
 0x95c   :  { %v804_v60 = vsub.f32 %v800_v7, %v803_v16 }
 0x95e   :  { %v805_v2 = vmul.f32 1.442695, %v804_v60 }
 0x960   :  { %3401 = vpow2.f32 %v805_v2 }
 0x96a   :  { %v3402_v21 = vpop.eup %3401 }
 0x96b   :  { %v807_v24 = vsel %vm441_vm11, %v3402_v21, 0.0 }
 0x96c   :  { %808 = vadd.xlane.f32.xlu1 %v807_v24 }
 0x9f9   :  { %v809_v25 = vpop.xlane.xlu1 %808 }
 0x9fa   :  { %3403 = vrcp.f32 %v809_v25 }
 0xa04   :  { %v3404_v28 = vpop.eup %3403 }
 0xa05   :  { %v3813_v29 = vmul.f32 %v3404_v28, %v3402_v21 }
 0xa07   :  { %v812_v9 = vpack.c.bf16 %v3813_v29, %v3813_v29 }
 0xa09   :  { %3082 = vmatmul.mubr.msk.bf16.vlgmr.msra.gmra.mrb[20].mxu1 %vm441_vm11, %v812_v9 }
 0xa0a   :  { %3094 = vmatpush3.bf16.msra.mxu1 %v3722_v50  ;;  %3101 = vmatprep.mubr.msk.bf16.mxu1 %vm3515_vm10, %v3514_v18 }
 0xa0b   :  { %3095 = vmatprep.subr.bf16.mxu1 %v3514_v18 }
 0xa0e   :  { %3096 = vmatpush3.bf16.msra.mxu1 %v3730_v53 }
 0xa0f   :  { %3097 = vmatprep.subr.bf16.mxu1 %v3514_v18 }
 0xa12   :  { %3098 = vmatpush3.bf16.msra.mxu1 %v3741_v52 }
 0xa13   :  { %3099 = vmatprep.subr.bf16.mxu1 %v3514_v18 }
 0xa16   :  { %3100 = vmatpush3.bf16.msra.mxu1 %v3748_v61 }
 0xa17   :  { %3121 = vmatprep.subr.bf16.mxu1 %v3514_v18 }
 0xadc   :  { %v850_v30 = vpop.f32.mrb[20].mxu1 }
 0xadd   :  { %v856_v31 = vpack.c.bf16 %v850_v30, %v850_v30  ;;  %v3083_v32 = vpop.f32.mrb[21].mxu1 }
 0xade   :  { %v853_v33 = vpop.f32.mrb[22].mxu1 }
 0xadf   :  { %v3084_v34 = vpop.f32.mrb[23].mxu1  ;;  %3090 = vmatmul.mubr.msk.bf16.vlgmr.msra.gmra.mrb[28].mxu0 %vm224_vm9, %v856_v31 }
 0xae0   :  { %3106 = vmatpush3.bf16.msra.mxu0 %v3774_v38  ;;  %3109 = vmatprep.mubr.msk.bf16.mxu0 %vm3515_vm10, %v3514_v18 }
 0xae1   :  { %3107 = vmatprep.subr.bf16.mxu0 %v3514_v18 }
 0xae4   :  { %3108 = vmatpush3.bf16.msra.mxu0 %v3780_v39 }
 0xae5   :  { %3113 = vmatprep.subr.bf16.mxu0 %v3514_v18 }
 0xbb2   :  { %v894_v35 = vpop.f32.mrb[28].mxu0 }
 0xbb3   :  { %v900_v36 = vadd.f32 %v894_v35, %v3667_v10  ;;  %v3091_v37 = vpop.f32.mrb[29].mxu0 }
 0xbb4   :  { %v897_v40 = vpop.f32.mrb[30].mxu0 }
 0xbb5   :  { %v901_v51 = vmax.f32 %v900_v36, 0.0  ;;  %v3092_v46 = vpop.f32.mrb[31].mxu0 }
 0xbb7   :  { %v902_v47 = vpack.c.bf16 %v901_v51, %v901_v51 }
 0xbb9   :  { %v905_v49 = vsel %vm224_vm9, %v902_v47, %v3790_v57 }
 0xbba   :  { %3102 = vmatmul.mubr.msk.bf16.vlgmr.msra.gmra.mrb[24].mxu1 %vm599_vm13, %v905_v49 }
 0xbbb   :  { %3122 = vmatpush3.bf16.msra.mxu1 %v3694_v41  ;;  %3123 = vmatprep.mubr.msk.bf16.mxu1 %vm3515_vm10, %v3514_v18 }
 0xbbc   :  { %3135 = vmatprep.subr.bf16.mxu1 %v3514_v18 }
 0xc8d   :  { %v942_v54 = vpop.f32.mrb[24].mxu1 }
 0xc8e   :  { %v943_v10 = vadd.f32 %v942_v54, %v3764_v20  ;;  %v3103_v58 = vpop.f32.mrb[25].mxu1 }
 0xc8f   :  { %v945_v62 = vpop.f32.mrb[26].mxu1 }
 0xc90   :  { %955 = vrot.lane.b32.xlu0 %v943_v10, %s3516_s30  ;;  %v3104_v1 = vpop.f32.mrb[27].mxu1  ;;  %v2805_v3 = vmul.f32 -1.442695, %v943_v10 }
 0xc92   :  { %3405 = vpow2.f32 %v2805_v3 }
 0xc9c   :  { %v3406_v57 = vpop.eup %3405 }
 0xc9d   :  { %v951_v4 = vadd.f32 1.0, %v3406_v57 }
 0xc9f   :  { %3407 = vrcp.f32 %v951_v4 }
 0xca9   :  { %v3408_v7 = vpop.eup %3407 }
 0xcaa   :  { %v965_v60 = vsub.f32 1.0, %v3408_v7  ;;  %v971_v21 = vmul.f32 %v3408_v7, %v3786_v55 }
 0xd02   :  { %v956_v8 = vpop.permute.xlu0 %955 }
 0xd03   :  { %v958_v11 = vmul.f32 %v3408_v7, %v956_v8 }
 0xd05   :  { %960 = vrot.lane.b32.xlu1 %v958_v11, %s3517_s12 }
 0xd77   :  { %v961_v12 = vpop.permute.xlu1 %960 }
 0xd78   :  { %v963_v15 = vadd.f32 %v961_v12, %v943_v10 }
 0xd7a   :  { %3409 = vtanh.f32 %v963_v15 }
 0xd84   :  { %v3410_v16 = vpop.eup %3409 }
 0xd85   :  { %967 = vrot.lane.b32.xlu0 %v3410_v16, %s3518_s17 }
 0xdf7   :  { %v968_v2 = vpop.permute.xlu0 %967 }
 0xdf8   :  { %v970_v24 = vmul.f32 %v968_v2, %v965_v60 }
 0xdfa   :  { %v3848_v25 = vadd.f32 %v971_v21, %v970_v24 }
 0xdfc   :  { %v3852_v28 = vpack.c.bf16 %v3848_v25, %v3848_v25 }
 0xdfe   :  { %975 = vrot.lane.b32.xlu1 %v3852_v28, %s3518_s17 }
 0xe70   :  { %v976_v9 = vpop.permute.xlu1 %975 }
 0xe71   :  { %3110 = vmatmul.mubr.msk.bf16.vlgmr.msra.gmra.mrb[32].mxu0 %vm224_vm9, %v976_v9 }
 0xe72   :  { %3114 = vmatpush3.bf16.msra.mxu0 %v3603_v43  ;;  %3117 = vmatprep.mubr.msk.bf16.mxu0 %vm3515_vm10, %v3514_v18 }
 0xe73   :  { %3115 = vmatprep.subr.bf16.mxu0 %v3514_v18 }
 0xe76   :  { %3116 = vmatpush3.bf16.msra.mxu0 %v3613_v45 }
 0xe77   :  { %3127 = vmatprep.subr.bf16.mxu0 %v3514_v18 }
 0xe79   :  { %3118 = vmatmul.mubr.msk.bf16.vlgmr.msra.gmra.mrb[36].mxu0 %vm224_vm9, %v976_v9 }
 0xe7a   :  { %3128 = vmatpush3.bf16.msra.mxu0 %v3701_v42  ;;  %3131 = vmatprep.mubr.msk.bf16.mxu0 %vm3515_vm10, %v3514_v18 }
 0xe7b   :  { %3129 = vmatprep.subr.bf16.mxu0 %v3514_v18 }
 0xe7e   :  { %3130 = vmatpush3.bf16.msra.mxu0 %v3707_v44 }
 0xe7f   :  { %3147 = vmatprep.subr.bf16.mxu0 %v3514_v18 }
 0xf44   :  { %v3870_v30 = vpop.f32.mrb[32].mxu0 }
 0xf45   :  { %v3111_v31 = vpop.f32.mrb[33].mxu0 }
 0xf46   :  { %v1017_v32 = vpop.f32.mrb[34].mxu0 }
 0xf47   :  { %v3112_v33 = vpop.f32.mrb[35].mxu0 }
 0xf4c   :  { %v1079_v34 = vpop.f32.mrb[36].mxu0 }
 0xf4d   :  { %v1085_v35 = vadd.f32 %v1079_v34, %v3652_v63  ;;  %v3119_v36 = vpop.f32.mrb[37].mxu0 }
 0xf4e   :  { %v1082_v37 = vpop.f32.mrb[38].mxu0 }
 0xf4f   :  { %v3120_v40 = vpop.f32.mrb[39].mxu0  ;;  %v1086_v51 = vsel %vm441_vm11, %v1085_v35, -inf }
 0xf50   :  { %1087 = vmax.xlane.f32.xlu0 %v1086_v51 }
 0xfdd   :  { %v1088_v46 = vpop.xlane.xlu0 %1087 }
 0xfde   :  { %v1089_v47 = vsub.f32 %v1085_v35, %v1088_v46 }
 0xfe0   :  { %v1090_v49 = vmul.f32 1.442695, %v1089_v47 }
 0xfe2   :  { %3411 = vpow2.f32 %v1090_v49 }
 0xfec   :  { %v3412_v54 = vpop.eup %3411 }
 0xfed   :  { %v1092_v10 = vsel %vm441_vm11, %v3412_v54, 0.0 }
 0xfee   :  { %1093 = vadd.xlane.f32.xlu1 %v1092_v10 }
0x107b   :  { %v1094_v58 = vpop.xlane.xlu1 %1093 }
0x107c   :  { %3413 = vrcp.f32 %v1094_v58 }
0x1086   :  { %v3414_v62 = vpop.eup %3413 }
0x1087   :  { %v3875_v1 = vmul.f32 %v3414_v62, %v3412_v54 }
0x1089   :  { %v1097_v63 = vpack.c.bf16 %v3875_v1, %v3875_v1 }
0x108b   :  { %3124 = vmatmul.mubr.msk.bf16.vlgmr.msra.gmra.mrb[28].mxu1 %vm441_vm11, %v1097_v63 }
0x108c   :  { %3136 = vmatpush3.bf16.msra.mxu1 %v3722_v50  ;;  %3143 = vmatprep.mubr.msk.bf16.mxu1 %vm3515_vm10, %v3514_v18 }
0x108d   :  { %3137 = vmatprep.subr.bf16.mxu1 %v3514_v18 }
0x1090   :  { %3138 = vmatpush3.bf16.msra.mxu1 %v3730_v53 }
0x1091   :  { %3139 = vmatprep.subr.bf16.mxu1 %v3514_v18 }
0x1094   :  { %3140 = vmatpush3.bf16.msra.mxu1 %v3741_v52 }
0x1095   :  { %3141 = vmatprep.subr.bf16.mxu1 %v3514_v18 }
0x1098   :  { %3142 = vmatpush3.bf16.msra.mxu1 %v3748_v61 }
0x1099   :  { %3163 = vmatprep.subr.bf16.mxu1 %v3514_v18 }
0x115e   :  { %v1135_v3 = vpop.f32.mrb[28].mxu1 }
0x115f   :  { %v1141_v57 = vpack.c.bf16 %v1135_v3, %v1135_v3  ;;  %v3125_v4 = vpop.f32.mrb[29].mxu1 }
0x1160   :  { %v1138_v7 = vpop.f32.mrb[30].mxu1 }
0x1161   :  { %v3126_v8 = vpop.f32.mrb[31].mxu1  ;;  %3132 = vmatmul.mubr.msk.bf16.vlgmr.msra.gmra.mrb[40].mxu0 %vm224_vm9, %v1141_v57 }
0x1162   :  { %3148 = vmatpush3.bf16.msra.mxu0 %v3774_v38  ;;  %3151 = vmatprep.mubr.msk.bf16.mxu0 %vm3515_vm10, %v3514_v18 }
0x1163   :  { %3149 = vmatprep.subr.bf16.mxu0 %v3514_v18 }
0x1166   :  { %3150 = vmatpush3.bf16.msra.mxu0 %v3780_v39 }
0x1167   :  { %3155 = vmatprep.subr.bf16.mxu0 %v3514_v18 }
0x1234   :  { %v1179_v11 = vpop.f32.mrb[40].mxu0 }
0x1235   :  { %v1185_v12 = vadd.f32 %v1179_v11, %v3655_v0  ;;  %v3133_v15 = vpop.f32.mrb[41].mxu0 }
0x1236   :  { %v1182_v16 = vpop.f32.mrb[42].mxu0 }
0x1237   :  { %v1186_v60 = vmax.f32 %v1185_v12, 0.0  ;;  %v3134_v2 = vpop.f32.mrb[43].mxu0 }
0x1239   :  { %v1187_v21 = vpack.c.bf16 %v1186_v60, %v1186_v60 }
0x123b   :  { %v1190_v24 = vsel %vm224_vm9, %v1187_v21, %v3852_v28 }
0x123c   :  { %3144 = vmatmul.mubr.msk.bf16.vlgmr.msra.gmra.mrb[32].mxu1 %vm599_vm13, %v1190_v24 }
0x123d   :  { %3164 = vmatpush3.bf16.msra.mxu1 %v3694_v41  ;;  %3165 = vmatprep.mubr.msk.bf16.mxu1 %vm3515_vm10, %v3514_v18 }
0x123e   :  { %3177 = vmatprep.subr.bf16.mxu1 %v3514_v18 }
0x130f   :  { %v1227_v9 = vpop.f32.mrb[32].mxu1 }
0x1310   :  { %v1228_v0 = vadd.f32 %v1227_v9, %v3764_v20  ;;  %v3145_v31 = vpop.f32.mrb[33].mxu1 }
0x1311   :  { %v1230_v32 = vpop.f32.mrb[34].mxu1 }
0x1312   :  { %1240 = vrot.lane.b32.xlu0 %v1228_v0, %s3516_s30  ;;  %v3146_v33 = vpop.f32.mrb[35].mxu1  ;;  %v2812_v34 = vmul.f32 -1.442695, %v1228_v0 }
0x1314   :  { %3415 = vpow2.f32 %v2812_v34 }
0x131e   :  { %v3416_v28 = vpop.eup %3415 }
0x131f   :  { %v1236_v35 = vadd.f32 1.0, %v3416_v28 }
0x1321   :  { %3417 = vrcp.f32 %v1236_v35 }
0x132b   :  { %v3418_v36 = vpop.eup %3417 }
0x132c   :  { %v1250_v49 = vsub.f32 1.0, %v3418_v36  ;;  %v1256_v10 = vmul.f32 %v3418_v36, %v3848_v25 }
0x1384   :  { %v1241_v37 = vpop.permute.xlu0 %1240 }
0x1385   :  { %v1243_v40 = vmul.f32 %v3418_v36, %v1241_v37 }
0x1387   :  { %1245 = vrot.lane.b32.xlu1 %v1243_v40, %s3517_s12 }
0x13f9   :  { %v1246_v51 = vpop.permute.xlu1 %1245 }
0x13fa   :  { %v1248_v46 = vadd.f32 %v1246_v51, %v1228_v0 }
0x13fc   :  { %3419 = vtanh.f32 %v1248_v46 }
0x1406   :  { %v3420_v47 = vpop.eup %3419 }
0x1407   :  { %1252 = vrot.lane.b32.xlu0 %v3420_v47, %s3518_s17 }
0x1479   :  { %v1253_v54 = vpop.permute.xlu0 %1252 }
0x147a   :  { %v1255_v58 = vmul.f32 %v1253_v54, %v1250_v49 }
0x147c   :  { %v3910_v62 = vadd.f32 %v1256_v10, %v1255_v58 }
0x147e   :  { %v3914_v63 = vpack.c.bf16 %v3910_v62, %v3910_v62 }
0x1480   :  { %1260 = vrot.lane.b32.xlu1 %v3914_v63, %s3518_s17 }
0x14f2   :  { %v1261_v3 = vpop.permute.xlu1 %1260 }
0x14f3   :  { %3152 = vmatmul.mubr.msk.bf16.vlgmr.msra.gmra.mrb[44].mxu0 %vm224_vm9, %v1261_v3 }
0x14f4   :  { %3156 = vmatpush3.bf16.msra.mxu0 %v3603_v43  ;;  %3159 = vmatprep.mubr.msk.bf16.mxu0 %vm3515_vm10, %v3514_v18 }
0x14f5   :  { %3157 = vmatprep.subr.bf16.mxu0 %v3514_v18 }
0x14f8   :  { %3158 = vmatpush3.bf16.msra.mxu0 %v3613_v45 }
0x14f9   :  { %3169 = vmatprep.subr.bf16.mxu0 %v3514_v18 }
0x14fb   :  { %3160 = vmatmul.mubr.msk.bf16.vlgmr.msra.gmra.mrb[48].mxu0 %vm224_vm9, %v1261_v3 }
0x14fc   :  { %3170 = vmatpush3.bf16.msra.mxu0 %v3701_v42  ;;  %3173 = vmatprep.mubr.msk.bf16.mxu0 %vm3515_vm10, %v3514_v18 }
0x14fd   :  { %3171 = vmatprep.subr.bf16.mxu0 %v3514_v18 }
0x1500   :  { %3172 = vmatpush3.bf16.msra.mxu0 %v3707_v44 }
0x1501   :  { %3189 = vmatprep.subr.bf16.mxu0 %v3514_v18 }
0x15c6   :  { %v3932_v57 = vpop.f32.mrb[44].mxu0 }
0x15c7   :  { %v3153_v4 = vpop.f32.mrb[45].mxu0 }
0x15c8   :  { %v1302_v7 = vpop.f32.mrb[46].mxu0 }
0x15c9   :  { %v3154_v8 = vpop.f32.mrb[47].mxu0 }
0x15ce   :  { %v1364_v11 = vpop.f32.mrb[48].mxu0 }
0x15cf   :  { %v1370_v12 = vadd.f32 %v1364_v11, %v3659_v5  ;;  %v3161_v15 = vpop.f32.mrb[49].mxu0 }
0x15d0   :  { %v1367_v16 = vpop.f32.mrb[50].mxu0 }
0x15d1   :  { %v3162_v60 = vpop.f32.mrb[51].mxu0  ;;  %v1371_v2 = vsel %vm441_vm11, %v1370_v12, -inf }
0x15d2   :  { %1372 = vmax.xlane.f32.xlu0 %v1371_v2 }
0x165f   :  { %v1373_v21 = vpop.xlane.xlu0 %1372 }
0x1660   :  { %v1374_v24 = vsub.f32 %v1370_v12, %v1373_v21 }
0x1662   :  { %v1375_v9 = vmul.f32 1.442695, %v1374_v24 }
0x1664   :  { %3421 = vpow2.f32 %v1375_v9 }
0x166e   :  { %v3422_v0 = vpop.eup %3421 }
0x166f   :  { %v1377_v31 = vsel %vm441_vm11, %v3422_v0, 0.0 }
0x1670   :  { %1378 = vadd.xlane.f32.xlu1 %v1377_v31 }
0x16fd   :  { %v1379_v32 = vpop.xlane.xlu1 %1378 }
0x16fe   :  { %3423 = vrcp.f32 %v1379_v32 }
0x1708   :  { %v3424_v33 = vpop.eup %3423 }
0x1709   :  { %v3937_v34 = vmul.f32 %v3424_v33, %v3422_v0 }
0x170b   :  { %v1382_v5 = vpack.c.bf16 %v3937_v34, %v3937_v34 }
0x170d   :  { %3166 = vmatmul.mubr.msk.bf16.vlgmr.msra.gmra.mrb[36].mxu1 %vm441_vm11, %v1382_v5 }
0x170e   :  { %3178 = vmatpush3.bf16.msra.mxu1 %v3722_v50  ;;  %3185 = vmatprep.mubr.msk.bf16.mxu1 %vm3515_vm10, %v3514_v18 }
0x170f   :  { %3179 = vmatprep.subr.bf16.mxu1 %v3514_v18 }
0x1712   :  { %3180 = vmatpush3.bf16.msra.mxu1 %v3730_v53 }
0x1713   :  { %3181 = vmatprep.subr.bf16.mxu1 %v3514_v18 }
0x1716   :  { %3182 = vmatpush3.bf16.msra.mxu1 %v3741_v52 }
0x1717   :  { %3183 = vmatprep.subr.bf16.mxu1 %v3514_v18 }
0x171a   :  { %3184 = vmatpush3.bf16.msra.mxu1 %v3748_v61 }
0x171b   :  { %3205 = vmatprep.subr.bf16.mxu1 %v3514_v18 }
0x17e0   :  { %v1420_v28 = vpop.f32.mrb[36].mxu1 }
0x17e1   :  { %v1426_v35 = vpack.c.bf16 %v1420_v28, %v1420_v28  ;;  %v3167_v36 = vpop.f32.mrb[37].mxu1 }
0x17e2   :  { %v1423_v37 = vpop.f32.mrb[38].mxu1 }
0x17e3   :  { %v3168_v40 = vpop.f32.mrb[39].mxu1  ;;  %3174 = vmatmul.mubr.msk.bf16.vlgmr.msra.gmra.mrb[52].mxu0 %vm224_vm9, %v1426_v35 }
0x17e4   :  { %3190 = vmatpush3.bf16.msra.mxu0 %v3774_v38  ;;  %3193 = vmatprep.mubr.msk.bf16.mxu0 %vm3515_vm10, %v3514_v18 }
0x17e5   :  { %3191 = vmatprep.subr.bf16.mxu0 %v3514_v18 }
0x17e8   :  { %3192 = vmatpush3.bf16.msra.mxu0 %v3780_v39 }
0x17e9   :  { %3197 = vmatprep.subr.bf16.mxu0 %v3514_v18 }
0x18b6   :  { %v1464_v51 = vpop.f32.mrb[52].mxu0 }
0x18b7   :  { %v1470_v46 = vadd.f32 %v1464_v51, %v3662_v6  ;;  %v3175_v47 = vpop.f32.mrb[53].mxu0 }
0x18b8   :  { %v1467_v49 = vpop.f32.mrb[54].mxu0 }
0x18b9   :  { %v1471_v54 = vmax.f32 %v1470_v46, 0.0  ;;  %v3176_v10 = vpop.f32.mrb[55].mxu0 }
0x18bb   :  { %v1472_v58 = vpack.c.bf16 %v1471_v54, %v1471_v54 }
0x18bd   :  { %v1475_v3 = vsel %vm224_vm9, %v1472_v58, %v3914_v63 }
0x18be   :  { %3186 = vmatmul.mubr.msk.bf16.vlgmr.msra.gmra.mrb[40].mxu1 %vm599_vm13, %v1475_v3 }
0x18bf   :  { %3206 = vmatpush3.bf16.msra.mxu1 %v3694_v41  ;;  %3207 = vmatprep.mubr.msk.bf16.mxu1 %vm3515_vm10, %v3514_v18 }
0x18c0   :  { %3219 = vmatprep.subr.bf16.mxu1 %v3514_v18 }
0x1991   :  { %v1512_v4 = vpop.f32.mrb[40].mxu1 }
0x1992   :  { %v1513_v6 = vadd.f32 %v1512_v4, %v3764_v20  ;;  %v3187_v7 = vpop.f32.mrb[41].mxu1 }
0x1993   :  { %v1515_v8 = vpop.f32.mrb[42].mxu1 }
0x1994   :  { %1525 = vrot.lane.b32.xlu0 %v1513_v6, %s3516_s30  ;;  %v3188_v11 = vpop.f32.mrb[43].mxu1  ;;  %v2819_v12 = vmul.f32 -1.442695, %v1513_v6 }
0x1996   :  { %3425 = vpow2.f32 %v2819_v12 }
0x19a0   :  { %v3426_v63 = vpop.eup %3425 }
0x19a1   :  { %v1521_v15 = vadd.f32 1.0, %v3426_v63 }
0x19a3   :  { %3427 = vrcp.f32 %v1521_v15 }
0x19ad   :  { %v3428_v16 = vpop.eup %3427 }
0x19ae   :  { %v1535_v0 = vsub.f32 1.0, %v3428_v16  ;;  %v1541_v32 = vmul.f32 %v3428_v16, %v3910_v62 }
0x1a06   :  { %v1526_v60 = vpop.permute.xlu0 %1525 }
0x1a07   :  { %v1528_v2 = vmul.f32 %v3428_v16, %v1526_v60 }
0x1a09   :  { %1530 = vrot.lane.b32.xlu1 %v1528_v2, %s3517_s12 }
0x1a7b   :  { %v1531_v21 = vpop.permute.xlu1 %1530 }
0x1a7c   :  { %v1533_v24 = vadd.f32 %v1531_v21, %v1513_v6 }
0x1a7e   :  { %3429 = vtanh.f32 %v1533_v24 }
0x1a88   :  { %v3430_v9 = vpop.eup %3429 }
0x1a89   :  { %1537 = vrot.lane.b32.xlu0 %v3430_v9, %s3518_s17 }
0x1afb   :  { %v1538_v31 = vpop.permute.xlu0 %1537 }
0x1afc   :  { %v1540_v33 = vmul.f32 %v1538_v31, %v1535_v0 }
0x1afe   :  { %v3972_v5 = vadd.f32 %v1541_v32, %v1540_v33 }
0x1b00   :  { %v3976_v28 = vpack.c.bf16 %v3972_v5, %v3972_v5 }
0x1b02   :  { %1545 = vrot.lane.b32.xlu1 %v3976_v28, %s3518_s17 }
0x1b74   :  { %v1546_v35 = vpop.permute.xlu1 %1545 }
0x1b75   :  { %3194 = vmatmul.mubr.msk.bf16.vlgmr.msra.gmra.mrb[56].mxu0 %vm224_vm9, %v1546_v35 }
0x1b76   :  { %3198 = vmatpush3.bf16.msra.mxu0 %v3603_v43  ;;  %3201 = vmatprep.mubr.msk.bf16.mxu0 %vm3515_vm10, %v3514_v18 }
0x1b77   :  { %3199 = vmatprep.subr.bf16.mxu0 %v3514_v18 }
0x1b7a   :  { %3200 = vmatpush3.bf16.msra.mxu0 %v3613_v45 }
0x1b7b   :  { %3211 = vmatprep.subr.bf16.mxu0 %v3514_v18 }
0x1b7d   :  { %3202 = vmatmul.mubr.msk.bf16.vlgmr.msra.gmra.mrb[60].mxu0 %vm224_vm9, %v1546_v35 }
0x1b7e   :  { %3212 = vmatpush3.bf16.msra.mxu0 %v3701_v42  ;;  %3215 = vmatprep.mubr.msk.bf16.mxu0 %vm3515_vm10, %v3514_v18 }
0x1b7f   :  { %3213 = vmatprep.subr.bf16.mxu0 %v3514_v18 }
0x1b82   :  { %3214 = vmatpush3.bf16.msra.mxu0 %v3707_v44 }
0x1b83   :  { %3231 = vmatprep.subr.bf16.mxu0 %v3514_v18 }
0x1c48   :  { %v3994_v43 = vpop.f32.mrb[56].mxu0 }
0x1c49   :  { %v3195_v36 = vpop.f32.mrb[57].mxu0 }
0x1c4a   :  { %v1587_v37 = vpop.f32.mrb[58].mxu0 }
0x1c4b   :  { %v3196_v45 = vpop.f32.mrb[59].mxu0 }
0x1c50   :  { %v1649_v40 = vpop.f32.mrb[60].mxu0 }
0x1c51   :  { %v1655_v51 = vadd.f32 %v1649_v40, %v3674_v17  ;;  %v3203_v46 = vpop.f32.mrb[61].mxu0 }
0x1c52   :  { %v1652_v47 = vpop.f32.mrb[62].mxu0 }
0x1c53   :  { %v3204_v49 = vpop.f32.mrb[63].mxu0  ;;  %v1656_v54 = vsel %vm441_vm11, %v1655_v51, -inf }
0x1c54   :  { %1657 = vmax.xlane.f32.xlu0 %v1656_v54 }
0x1ce1   :  { %v1658_v10 = vpop.xlane.xlu0 %1657 }
0x1ce2   :  { %v1659_v58 = vsub.f32 %v1655_v51, %v1658_v10 }
0x1ce4   :  { %v1660_v3 = vmul.f32 1.442695, %v1659_v58 }
0x1ce6   :  { %3431 = vpow2.f32 %v1660_v3 }
0x1cf0   :  { %v3432_v4 = vpop.eup %3431 }
0x1cf1   :  { %v1662_v6 = vsel %vm441_vm11, %v3432_v4, 0.0 }
0x1cf2   :  { %1663 = vadd.xlane.f32.xlu1 %v1662_v6 }
0x1d7f   :  { %v1664_v7 = vpop.xlane.xlu1 %1663 }
0x1d80   :  { %3433 = vrcp.f32 %v1664_v7 }
0x1d8a   :  { %v3434_v8 = vpop.eup %3433 }
0x1d8b   :  { %v3999_v11 = vmul.f32 %v3434_v8, %v3432_v4 }
0x1d8d   :  { %v1667_v17 = vpack.c.bf16 %v3999_v11, %v3999_v11 }
0x1d8f   :  { %3208 = vmatmul.mubr.msk.bf16.vlgmr.msra.gmra.mrb[44].mxu1 %vm441_vm11, %v1667_v17 }
0x1d90   :  { %3220 = vmatpush3.bf16.msra.mxu1 %v3722_v50  ;;  %3227 = vmatprep.mubr.msk.bf16.mxu1 %vm3515_vm10, %v3514_v18 }
0x1d91   :  { %3221 = vmatprep.subr.bf16.mxu1 %v3514_v18 }
0x1d94   :  { %3222 = vmatpush3.bf16.msra.mxu1 %v3730_v53 }
0x1d95   :  { %3223 = vmatprep.subr.bf16.mxu1 %v3514_v18 }
0x1d98   :  { %3224 = vmatpush3.bf16.msra.mxu1 %v3741_v52 }
0x1d99   :  { %3225 = vmatprep.subr.bf16.mxu1 %v3514_v18 }
0x1d9c   :  { %3226 = vmatpush3.bf16.msra.mxu1 %v3748_v61 }
0x1d9d   :  { %3247 = vmatprep.subr.bf16.mxu1 %v3514_v18 }
0x1e62   :  { %v1705_v12 = vpop.f32.mrb[44].mxu1 }
0x1e63   :  { %v1711_v63 = vpack.c.bf16 %v1705_v12, %v1705_v12  ;;  %v3209_v15 = vpop.f32.mrb[45].mxu1 }
0x1e64   :  { %v1708_v16 = vpop.f32.mrb[46].mxu1  ;;  %v4055_v15 = vld [vmem:[%s4424_s3 + $0x20] sm:$0xff]  }
0x1e65   :  { %v3210_v60 = vpop.f32.mrb[47].mxu1  ;;  %3216 = vmatmul.mubr.msk.bf16.vlgmr.msra.gmra.mrb[64].mxu0 %vm224_vm9, %v1711_v63  ;;  %v4046_v63 = vld [vmem:[%s4424_s3 + $0x18] sm:$0xff]  }
0x1e66   :  { %3232 = vmatpush3.bf16.msra.mxu0 %v3774_v38  ;;  %3235 = vmatprep.mubr.msk.bf16.mxu0 %vm3515_vm10, %v3514_v18 }
0x1e67   :  { %3233 = vmatprep.subr.bf16.mxu0 %v3514_v18 }
0x1e6a   :  { %3234 = vmatpush3.bf16.msra.mxu0 %v3780_v39 }
0x1e6b   :  { %3239 = vmatprep.subr.bf16.mxu0 %v3514_v18 }
0x1f38   :  { %v1749_v2 = vpop.f32.mrb[64].mxu0 }
0x1f39   :  { %v1755_v21 = vadd.f32 %v1749_v2, %v3677_v19  ;;  %v3217_v24 = vpop.f32.mrb[65].mxu0 }
0x1f3a   :  { %v1752_v9 = vpop.f32.mrb[66].mxu0 }
0x1f3b   :  { %v1756_v0 = vmax.f32 %v1755_v21, 0.0  ;;  %v3218_v31 = vpop.f32.mrb[67].mxu0 }
0x1f3d   :  { %v1757_v32 = vpack.c.bf16 %v1756_v0, %v1756_v0 }
0x1f3f   :  { %v1760_v33 = vsel %vm224_vm9, %v1757_v32, %v3976_v28 }
0x1f40   :  { %3228 = vmatmul.mubr.msk.bf16.vlgmr.msra.gmra.mrb[48].mxu1 %vm599_vm13, %v1760_v33 }
0x1f41   :  { %3248 = vmatpush3.bf16.msra.mxu1 %v3694_v41  ;;  %3249 = vmatprep.mubr.msk.bf16.mxu1 %vm3515_vm10, %v3514_v18 }
0x1f42   :  { %3261 = vmatprep.subr.bf16.mxu1 %v3514_v18 }
0x2013   :  { %v1797_v35 = vpop.f32.mrb[48].mxu1 }
0x2014   :  { %v1798_v19 = vadd.f32 %v1797_v35, %v3764_v20  ;;  %v3229_v36 = vpop.f32.mrb[49].mxu1 }
0x2015   :  { %v1800_v37 = vpop.f32.mrb[50].mxu1 }
0x2016   :  { %1810 = vrot.lane.b32.xlu0 %v1798_v19, %s3516_s30  ;;  %v3230_v45 = vpop.f32.mrb[51].mxu1  ;;  %v2826_v40 = vmul.f32 -1.442695, %v1798_v19 }
0x2018   :  { %3435 = vpow2.f32 %v2826_v40 }
0x2022   :  { %v3436_v28 = vpop.eup %3435 }
0x2023   :  { %v1806_v51 = vadd.f32 1.0, %v3436_v28 }
0x2025   :  { %3437 = vrcp.f32 %v1806_v51 }
0x202f   :  { %v3438_v46 = vpop.eup %3437 }
0x2030   :  { %v1820_v3 = vsub.f32 1.0, %v3438_v46  ;;  %v1826_v6 = vmul.f32 %v3438_v46, %v3972_v5 }
0x2088   :  { %v1811_v47 = vpop.permute.xlu0 %1810 }
0x2089   :  { %v1813_v49 = vmul.f32 %v3438_v46, %v1811_v47 }
0x208b   :  { %1815 = vrot.lane.b32.xlu1 %v1813_v49, %s3517_s12 }
0x20fd   :  { %v1816_v54 = vpop.permute.xlu1 %1815 }
0x20fe   :  { %v1818_v10 = vadd.f32 %v1816_v54, %v1798_v19 }
0x2100   :  { %3439 = vtanh.f32 %v1818_v10 }
0x210a   :  { %v3440_v58 = vpop.eup %3439 }
0x210b   :  { %1822 = vrot.lane.b32.xlu0 %v3440_v58, %s3518_s17 }
0x217d   :  { %v1823_v4 = vpop.permute.xlu0 %1822 }
0x217e   :  { %v1825_v7 = vmul.f32 %v1823_v4, %v1820_v3 }
0x2180   :  { %v4034_v8 = vadd.f32 %v1826_v6, %v1825_v7 }
0x2182   :  { %v4038_v17 = vpack.c.bf16 %v4034_v8, %v4034_v8 }
0x2184   :  { %1830 = vrot.lane.b32.xlu1 %v4038_v17, %s3518_s17 }
0x21f6   :  { %v1831_v12 = vpop.permute.xlu1 %1830 }
0x21f7   :  { %3236 = vmatmul.mubr.msk.bf16.vlgmr.msra.gmra.mrb[68].mxu0 %vm224_vm9, %v1831_v12 }
0x21f8   :  { %3240 = vmatpush3.bf16.msra.mxu0 %v4046_v63  ;;  %3243 = vmatprep.mubr.msk.bf16.mxu0 %vm3515_vm10, %v3514_v18 }
0x21f9   :  { %3241 = vmatprep.subr.bf16.mxu0 %v3514_v18 }
0x21fc   :  { %3242 = vmatpush3.bf16.msra.mxu0 %v4055_v15 }
0x21fd   :  { %3253 = vmatprep.subr.bf16.mxu0 %v3514_v18 }
0x21ff   :  { %3244 = vmatmul.mubr.msk.bf16.vlgmr.msra.gmra.mrb[72].mxu0 %vm224_vm9, %v1831_v12 }
0x2200   :  { %3254 = vmatpush3.bf16.msra.mxu0 %v3701_v42  ;;  %3257 = vmatprep.mubr.msk.bf16.mxu0 %vm3515_vm10, %v3514_v18 }
0x2201   :  { %3255 = vmatprep.subr.bf16.mxu0 %v3514_v18 }
0x2204   :  { %3256 = vmatpush3.bf16.msra.mxu0 %v3707_v44 }
0x2205   :  { %3273 = vmatprep.subr.bf16.mxu0 %v3514_v18 }
0x22ca   :  { %v4066_v16 = vpop.f32.mrb[68].mxu0 }
0x22cb   :  { %v3237_v60 = vpop.f32.mrb[69].mxu0 }
0x22cc   :  { %v1872_v2 = vpop.f32.mrb[70].mxu0 }
0x22cd   :  { %v3238_v21 = vpop.f32.mrb[71].mxu0 }
0x22d2   :  { %v1934_v24 = vpop.f32.mrb[72].mxu0 }
0x22d3   :  { %v1940_v9 = vadd.f32 %v1934_v24, %v3684_v26  ;;  %v3245_v0 = vpop.f32.mrb[73].mxu0 }
0x22d4   :  { %v1937_v31 = vpop.f32.mrb[74].mxu0 }
0x22d5   :  { %v3246_v42 = vpop.f32.mrb[75].mxu0  ;;  %v1941_v32 = vsel %vm441_vm11, %v1940_v9, -inf }
0x22d6   :  { %1942 = vmax.xlane.f32.xlu0 %v1941_v32 }
0x2363   :  { %v1943_v33 = vpop.xlane.xlu0 %1942 }
0x2364   :  { %v1944_v35 = vsub.f32 %v1940_v9, %v1943_v33 }
0x2366   :  { %v1945_v19 = vmul.f32 1.442695, %v1944_v35 }
0x2368   :  { %3441 = vpow2.f32 %v1945_v19 }
0x2372   :  { %v3442_v44 = vpop.eup %3441 }
0x2373   :  { %v1947_v36 = vsel %vm441_vm11, %v3442_v44, 0.0 }
0x2374   :  { %1948 = vadd.xlane.f32.xlu1 %v1947_v36  ;;  %v4125_v36 = vld [vmem:[%s4424_s3 + $0x38] sm:$0xff]  }
0x2401   :  { %v1949_v37 = vpop.xlane.xlu1 %1948 }
0x2402   :  { %3443 = vrcp.f32 %v1949_v37  ;;  %v4134_v37 = vld [vmem:[%s4424_s3 + $0x40] sm:$0xff]  }
0x240c   :  { %v3444_v45 = vpop.eup %3443 }
0x240d   :  { %v4071_v40 = vmul.f32 %v3444_v45, %v3442_v44 }
0x240f   :  { %v1952_v26 = vpack.c.bf16 %v4071_v40, %v4071_v40 }
0x2411   :  { %3250 = vmatmul.mubr.msk.bf16.vlgmr.msra.gmra.mrb[52].mxu1 %vm441_vm11, %v1952_v26 }
0x2412   :  { %3262 = vmatpush3.bf16.msra.mxu1 %v3722_v50  ;;  %3269 = vmatprep.mubr.msk.bf16.mxu1 %vm3515_vm10, %v3514_v18 }
0x2413   :  { %3263 = vmatprep.subr.bf16.mxu1 %v3514_v18 }
0x2416   :  { %3264 = vmatpush3.bf16.msra.mxu1 %v3730_v53 }
0x2417   :  { %3265 = vmatprep.subr.bf16.mxu1 %v3514_v18 }
0x241a   :  { %3266 = vmatpush3.bf16.msra.mxu1 %v3741_v52 }
0x241b   :  { %3267 = vmatprep.subr.bf16.mxu1 %v3514_v18 }
0x241e   :  { %3268 = vmatpush3.bf16.msra.mxu1 %v3748_v61 }
0x241f   :  { %3289 = vmatprep.subr.bf16.mxu1 %v3514_v18 }
0x24e4   :  { %v1990_v28 = vpop.f32.mrb[52].mxu1 }
0x24e5   :  { %v1996_v51 = vpack.c.bf16 %v1990_v28, %v1990_v28  ;;  %v3251_v50 = vpop.f32.mrb[53].mxu1 }
0x24e6   :  { %v1993_v46 = vpop.f32.mrb[54].mxu1 }
0x24e7   :  { %v3252_v47 = vpop.f32.mrb[55].mxu1  ;;  %3258 = vmatmul.mubr.msk.bf16.vlgmr.msra.gmra.mrb[76].mxu0 %vm224_vm9, %v1996_v51 }
0x24e8   :  { %3274 = vmatpush3.bf16.msra.mxu0 %v3774_v38  ;;  %3277 = vmatprep.mubr.msk.bf16.mxu0 %vm3515_vm10, %v3514_v18 }
0x24e9   :  { %3275 = vmatprep.subr.bf16.mxu0 %v3514_v18 }
0x24ec   :  { %3276 = vmatpush3.bf16.msra.mxu0 %v3780_v39 }
0x24ed   :  { %3281 = vmatprep.subr.bf16.mxu0 %v3514_v18 }
0x25ba   :  { %v2034_v53 = vpop.f32.mrb[76].mxu0 }
0x25bb   :  { %v2040_v52 = vadd.f32 %v2034_v53, %v3687_v27  ;;  %v3259_v61 = vpop.f32.mrb[77].mxu0 }
0x25bc   :  { %v2037_v49 = vpop.f32.mrb[78].mxu0 }
0x25bd   :  { %v2041_v54 = vmax.f32 %v2040_v52, 0.0  ;;  %v3260_v10 = vpop.f32.mrb[79].mxu0 }
0x25bf   :  { %v2042_v58 = vpack.c.bf16 %v2041_v54, %v2041_v54 }
0x25c1   :  { %v2045_v38 = vsel %vm224_vm9, %v2042_v58, %v4038_v17 }
0x25c2   :  { %3270 = vmatmul.mubr.msk.bf16.vlgmr.msra.gmra.mrb[56].mxu1 %vm599_vm13, %v2045_v38 }
0x25c3   :  { %3290 = vmatpush3.bf16.msra.mxu1 %v3694_v41  ;;  %3291 = vmatprep.mubr.msk.bf16.mxu1 %vm3515_vm10, %v3514_v18 }
0x25c4   :  { %3303 = vmatprep.subr.bf16.mxu1 %v3514_v18 }
0x2695   :  { %v2082_v39 = vpop.f32.mrb[56].mxu1 }
0x2696   :  { %v2083_v27 = vadd.f32 %v2082_v39, %v3764_v20  ;;  %v3271_v3 = vpop.f32.mrb[57].mxu1 }
0x2697   :  { %v2085_v4 = vpop.f32.mrb[58].mxu1 }
0x2698   :  { %2095 = vrot.lane.b32.xlu0 %v2083_v27, %s3516_s30  ;;  %v3272_v6 = vpop.f32.mrb[59].mxu1  ;;  %v2833_v7 = vmul.f32 -1.442695, %v2083_v27  ;;  %v4151_v4 = vld [vmem:[%s4424_s3 + $0x48] sm:$0xff]  }
0x2699   :  { %v4160_v6 = vld [vmem:[%s4424_s3 + $0x50] sm:$0xff]  }
0x269a   :  { %3445 = vpow2.f32 %v2833_v7  ;;  %v4167_v7 = vld [vmem:[%s4424_s3 + $0x58] sm:$0xff]  }
0x26a4   :  { %v3446_v17 = vpop.eup %3445 }
0x26a5   :  { %v2091_v12 = vadd.f32 1.0, %v3446_v17  ;;  %v4174_v17 = vld [vmem:[%s4424_s3 + $0x60] sm:$0xff]  }
0x26a7   :  { %3447 = vrcp.f32 %v2091_v12 }
0x26b1   :  { %v3448_v60 = vpop.eup %3447 }
0x26b2   :  { %v2105_v31 = vsub.f32 1.0, %v3448_v60  ;;  %v2111_v32 = vmul.f32 %v3448_v60, %v4034_v8 }
0x270a   :  { %v2096_v2 = vpop.permute.xlu0 %2095 }
0x270b   :  { %v2098_v21 = vmul.f32 %v3448_v60, %v2096_v2 }
0x270d   :  { %2100 = vrot.lane.b32.xlu1 %v2098_v21, %s3517_s12 }
0x277f   :  { %v2101_v24 = vpop.permute.xlu1 %2100 }
0x2780   :  { %v2103_v9 = vadd.f32 %v2101_v24, %v2083_v27 }
0x2782   :  { %3449 = vtanh.f32 %v2103_v9  ;;  %v4182_v9 = vld [vmem:[%s4424_s3 + $0x68] sm:$0xff]  }
0x278c   :  { %v3450_v0 = vpop.eup %3449 }
0x278d   :  { %2107 = vrot.lane.b32.xlu0 %v3450_v0, %s3518_s17  ;;  %v4191_v0 = vld [vmem:[%s4424_s3 + $0x70] sm:$0xff]  }
0x27ff   :  { %v2108_v42 = vpop.permute.xlu0 %2107 }
0x2800   :  { %v2110_v33 = vmul.f32 %v2108_v42, %v2105_v31 }
0x2802   :  { %v4106_v35 = vadd.f32 %v2111_v32, %v2110_v33 }
0x2804   :  { %v4110_v19 = vpack.c.bf16 %v4106_v35, %v4106_v35 }
0x2806   :  { %2115 = vrot.lane.b32.xlu1 %v4110_v19, %s3518_s17 }
0x2878   :  { %v2116_v44 = vpop.permute.xlu1 %2115 }
0x2879   :  { %3278 = vmatmul.mubr.msk.bf16.vlgmr.msra.gmra.mrb[80].mxu0 %vm224_vm9, %v2116_v44 }
0x287a   :  { %3282 = vmatpush3.bf16.msra.mxu0 %v4046_v63  ;;  %3285 = vmatprep.mubr.msk.bf16.mxu0 %vm3515_vm10, %v3514_v18 }
0x287b   :  { %3283 = vmatprep.subr.bf16.mxu0 %v3514_v18 }
0x287e   :  { %3284 = vmatpush3.bf16.msra.mxu0 %v4055_v15 }
0x287f   :  { %3295 = vmatprep.subr.bf16.mxu0 %v3514_v18 }
0x2881   :  { %3286 = vmatmul.mubr.msk.bf16.vlgmr.msra.gmra.mrb[84].mxu0 %vm224_vm9, %v2116_v44 }
0x2882   :  { %3296 = vmatpush3.bf16.msra.mxu0 %v4125_v36  ;;  %3299 = vmatprep.mubr.msk.bf16.mxu0 %vm3515_vm10, %v3514_v18 }
0x2883   :  { %3297 = vmatprep.subr.bf16.mxu0 %v3514_v18 }
0x2886   :  { %3298 = vmatpush3.bf16.msra.mxu0 %v4134_v37 }
0x2887   :  { %3315 = vmatprep.subr.bf16.mxu0 %v3514_v18 }
0x294c   :  { %v4138_v45 = vpop.f32.mrb[80].mxu0 }
0x294d   :  { %v3279_v26 = vpop.f32.mrb[81].mxu0 }
0x294e   :  { %v2157_v28 = vpop.f32.mrb[82].mxu0 }
0x294f   :  { %v3280_v51 = vpop.f32.mrb[83].mxu0 }
0x2954   :  { %v2219_v50 = vpop.f32.mrb[84].mxu0 }
0x2955   :  { %v2225_v46 = vadd.f32 %v2219_v50, %v3669_v13  ;;  %v3287_v47 = vpop.f32.mrb[85].mxu0 }
0x2956   :  { %v2222_v53 = vpop.f32.mrb[86].mxu0 }
0x2957   :  { %v3288_v52 = vpop.f32.mrb[87].mxu0  ;;  %v2226_v61 = vsel %vm441_vm11, %v2225_v46, -inf }
0x2958   :  { %2227 = vmax.xlane.f32.xlu0 %v2226_v61 }
0x29e5   :  { %v2228_v49 = vpop.xlane.xlu0 %2227 }
0x29e6   :  { %v2229_v54 = vsub.f32 %v2225_v46, %v2228_v49 }
0x29e8   :  { %v2230_v10 = vmul.f32 1.442695, %v2229_v54 }
0x29ea   :  { %3451 = vpow2.f32 %v2230_v10 }
0x29f4   :  { %v3452_v58 = vpop.eup %3451 }
0x29f5   :  { %v2232_v38 = vsel %vm441_vm11, %v3452_v58, 0.0 }
0x29f6   :  { %2233 = vadd.xlane.f32.xlu1 %v2232_v38 }
0x2a83   :  { %v2234_v39 = vpop.xlane.xlu1 %2233 }
0x2a84   :  { %3453 = vrcp.f32 %v2234_v39 }
0x2a8e   :  { %v3454_v27 = vpop.eup %3453 }
0x2a8f   :  { %v4143_v3 = vmul.f32 %v3454_v27, %v3452_v58 }
0x2a91   :  { %v2237_v13 = vpack.c.bf16 %v4143_v3, %v4143_v3 }
0x2a93   :  { %3292 = vmatmul.mubr.msk.bf16.vlgmr.msra.gmra.mrb[60].mxu1 %vm441_vm11, %v2237_v13 }
0x2a94   :  { %3304 = vmatpush3.bf16.msra.mxu1 %v4151_v4  ;;  %3311 = vmatprep.mubr.msk.bf16.mxu1 %vm3515_vm10, %v3514_v18 }
0x2a95   :  { %3305 = vmatprep.subr.bf16.mxu1 %v3514_v18 }
0x2a98   :  { %3306 = vmatpush3.bf16.msra.mxu1 %v4160_v6 }
0x2a99   :  { %3307 = vmatprep.subr.bf16.mxu1 %v3514_v18 }
0x2a9c   :  { %3308 = vmatpush3.bf16.msra.mxu1 %v4167_v7 }
0x2a9d   :  { %3309 = vmatprep.subr.bf16.mxu1 %v3514_v18 }
0x2aa0   :  { %3310 = vmatpush3.bf16.msra.mxu1 %v4174_v17 }
0x2aa1   :  { %3331 = vmatprep.subr.bf16.mxu1 %v3514_v18 }
0x2b66   :  { %v2275_v12 = vpop.f32.mrb[60].mxu1 }
0x2b67   :  { %v2281_v60 = vpack.c.bf16 %v2275_v12, %v2275_v12  ;;  %v3293_v2 = vpop.f32.mrb[61].mxu1 }
0x2b68   :  { %v2278_v21 = vpop.f32.mrb[62].mxu1 }
0x2b69   :  { %v3294_v24 = vpop.f32.mrb[63].mxu1  ;;  %3300 = vmatmul.mubr.msk.bf16.vlgmr.msra.gmra.mrb[88].mxu0 %vm224_vm9, %v2281_v60 }
0x2b6a   :  { %3316 = vmatpush3.bf16.msra.mxu0 %v4182_v9  ;;  %3319 = vmatprep.mubr.msk.bf16.mxu0 %vm3515_vm10, %v3514_v18 }
0x2b6b   :  { %3317 = vmatprep.subr.bf16.mxu0 %v3514_v18 }
0x2b6e   :  { %3318 = vmatpush3.bf16.msra.mxu0 %v4191_v0 }
0x2b6f   :  { %3323 = vmatprep.subr.bf16.mxu0 %v3514_v18 }
0x2c3c   :  { %v2319_v31 = vpop.f32.mrb[88].mxu0 }
0x2c3d   :  { %v2325_v42 = vadd.f32 %v2319_v31, %v3672_v14  ;;  %v3301_v32 = vpop.f32.mrb[89].mxu0 }
0x2c3e   :  { %v2322_v33 = vpop.f32.mrb[90].mxu0 }
0x2c3f   :  { %v2326_v44 = vmax.f32 %v2325_v42, 0.0  ;;  %v3302_v26 = vpop.f32.mrb[91].mxu0 }
0x2c41   :  { %v2327_v28 = vpack.c.bf16 %v2326_v44, %v2326_v44 }
0x2c43   :  { %v2330_v51 = vsel %vm224_vm9, %v2327_v28, %v4110_v19 }
0x2c44   :  { %3312 = vmatmul.mubr.msk.bf16.vlgmr.msra.gmra.mrb[64].mxu1 %vm599_vm13, %v2330_v51 }
0x2c45   :  { %3332 = vmatpush3.bf16.msra.mxu1 %v3694_v41  ;;  %3333 = vmatprep.mubr.msk.bf16.mxu1 %vm3515_vm10, %v3514_v18 }
0x2c46   :  { %3345 = vmatprep.subr.bf16.mxu1 %v3514_v18 }
0x2d17   :  { %v2367_v50 = vpop.f32.mrb[64].mxu1 }
0x2d18   :  { %v2368_v14 = vadd.f32 %v2367_v50, %v3764_v20  ;;  %v3313_v46 = vpop.f32.mrb[65].mxu1 }
0x2d19   :  { %v2370_v47 = vpop.f32.mrb[66].mxu1 }
0x2d1a   :  { %2380 = vrot.lane.b32.xlu0 %v2368_v14, %s3516_s30  ;;  %v3314_v53 = vpop.f32.mrb[67].mxu1  ;;  %v2840_v52 = vmul.f32 -1.442695, %v2368_v14 }
0x2d1c   :  { %3455 = vpow2.f32 %v2840_v52 }
0x2d26   :  { %v3456_v19 = vpop.eup %3455 }
0x2d27   :  { %v2376_v61 = vadd.f32 1.0, %v3456_v19 }
0x2d29   :  { %3457 = vrcp.f32 %v2376_v61 }
0x2d33   :  { %v3458_v49 = vpop.eup %3457 }
0x2d34   :  { %v2390_v39 = vsub.f32 1.0, %v3458_v49  ;;  %v2396_v13 = vmul.f32 %v3458_v49, %v4106_v35 }
0x2d8c   :  { %v2381_v41 = vpop.permute.xlu0 %2380 }
0x2d8d   :  { %v2383_v54 = vmul.f32 %v3458_v49, %v2381_v41 }
0x2d8f   :  { %2385 = vrot.lane.b32.xlu1 %v2383_v54, %s3517_s12 }
0x2e01   :  { %v2386_v10 = vpop.permute.xlu1 %2385 }
0x2e02   :  { %v2388_v58 = vadd.f32 %v2386_v10, %v2368_v14 }
0x2e04   :  { %3459 = vtanh.f32 %v2388_v58 }
0x2e0e   :  { %v3460_v38 = vpop.eup %3459 }
0x2e0f   :  { %2392 = vrot.lane.b32.xlu0 %v3460_v38, %s3518_s17 }
0x2e81   :  { %v2393_v27 = vpop.permute.xlu0 %2392 }
0x2e82   :  { %v2395_v12 = vmul.f32 %v2393_v27, %v2390_v39 }
0x2e84   :  { %v4208_v60 = vadd.f32 %v2396_v13, %v2395_v12 }
0x2e86   :  { %v4212_v2 = vpack.c.bf16 %v4208_v60, %v4208_v60 }
0x2e88   :  { %2400 = vrot.lane.b32.xlu1 %v4212_v2, %s3518_s17 }
0x2efa   :  { %v2401_v21 = vpop.permute.xlu1 %2400 }
0x2efb   :  { %3320 = vmatmul.mubr.msk.bf16.vlgmr.msra.gmra.mrb[92].mxu0 %vm224_vm9, %v2401_v21 }
0x2efc   :  { %3324 = vmatpush3.bf16.msra.mxu0 %v4046_v63  ;;  %3327 = vmatprep.mubr.msk.bf16.mxu0 %vm3515_vm10, %v3514_v18 }
0x2efd   :  { %3325 = vmatprep.subr.bf16.mxu0 %v3514_v18 }
0x2f00   :  { %3326 = vmatpush3.bf16.msra.mxu0 %v4055_v15 }
0x2f01   :  { %3337 = vmatprep.subr.bf16.mxu0 %v3514_v18 }
0x2f03   :  { %3328 = vmatmul.mubr.msk.bf16.vlgmr.msra.gmra.mrb[96].mxu0 %vm224_vm9, %v2401_v21 }
0x2f04   :  { %3338 = vmatpush3.bf16.msra.mxu0 %v4125_v36  ;;  %3341 = vmatprep.mubr.msk.bf16.mxu0 %vm3515_vm10, %v3514_v18 }
0x2f05   :  { %3339 = vmatprep.subr.bf16.mxu0 %v3514_v18 }
0x2f08   :  { %3340 = vmatpush3.bf16.msra.mxu0 %v4134_v37 }
0x2f09   :  { %3357 = vmatprep.subr.bf16.mxu0 %v3514_v18 }
0x2fce   :  { %v4230_v63 = vpop.f32.mrb[92].mxu0 }
0x2fcf   :  { %v3321_v24 = vpop.f32.mrb[93].mxu0 }
0x2fd0   :  { %v2442_v31 = vpop.f32.mrb[94].mxu0 }
0x2fd1   :  { %v3322_v15 = vpop.f32.mrb[95].mxu0 }
0x2fd6   :  { %v2504_v42 = vpop.f32.mrb[96].mxu0 }
0x2fd7   :  { %v2510_v32 = vadd.f32 %v2504_v42, %v3679_v22  ;;  %v3329_v33 = vpop.f32.mrb[97].mxu0 }
0x2fd8   :  { %v2507_v44 = vpop.f32.mrb[98].mxu0 }
0x2fd9   :  { %v3330_v36 = vpop.f32.mrb[99].mxu0  ;;  %v2511_v26 = vsel %vm441_vm11, %v2510_v32, -inf }
0x2fda   :  { %2512 = vmax.xlane.f32.xlu0 %v2511_v26 }
0x3067   :  { %v2513_v28 = vpop.xlane.xlu0 %2512 }
0x3068   :  { %v2514_v51 = vsub.f32 %v2510_v32, %v2513_v28 }
0x306a   :  { %v2515_v50 = vmul.f32 1.442695, %v2514_v51 }
0x306c   :  { %3461 = vpow2.f32 %v2515_v50 }
0x3076   :  { %v3462_v37 = vpop.eup %3461 }
0x3077   :  { %v2517_v14 = vsel %vm441_vm11, %v3462_v37, 0.0 }
0x3078   :  { %2518 = vadd.xlane.f32.xlu1 %v2517_v14 }
0x3105   :  { %v2519_v46 = vpop.xlane.xlu1 %2518 }
0x3106   :  { %3463 = vrcp.f32 %v2519_v46 }
0x3110   :  { %v3464_v47 = vpop.eup %3463 }
0x3111   :  { %v4235_v53 = vmul.f32 %v3464_v47, %v3462_v37 }
0x3113   :  { %v2522_v22 = vpack.c.bf16 %v4235_v53, %v4235_v53 }
0x3115   :  { %3334 = vmatmul.mubr.msk.bf16.vlgmr.msra.gmra.mrb[68].mxu1 %vm441_vm11, %v2522_v22 }
0x3116   :  { %3346 = vmatpush3.bf16.msra.mxu1 %v4151_v4  ;;  %3353 = vmatprep.mubr.msk.bf16.mxu1 %vm3515_vm10, %v3514_v18 }
0x3117   :  { %3347 = vmatprep.subr.bf16.mxu1 %v3514_v18 }
0x311a   :  { %3348 = vmatpush3.bf16.msra.mxu1 %v4160_v6 }
0x311b   :  { %3349 = vmatprep.subr.bf16.mxu1 %v3514_v18 }
0x311e   :  { %3350 = vmatpush3.bf16.msra.mxu1 %v4167_v7 }
0x311f   :  { %3351 = vmatprep.subr.bf16.mxu1 %v3514_v18 }
0x3122   :  { %3352 = vmatpush3.bf16.msra.mxu1 %v4174_v17 }
0x31e8   :  { %v2560_v52 = vpop.f32.mrb[68].mxu1 }
0x31e9   :  { %v2566_v19 = vpack.c.bf16 %v2560_v52, %v2560_v52  ;;  %v3335_v61 = vpop.f32.mrb[69].mxu1 }
0x31ea   :  { %v2563_v49 = vpop.f32.mrb[70].mxu1 }
0x31eb   :  { %v3336_v4 = vpop.f32.mrb[71].mxu1  ;;  %3342 = vmatmul.mubr.msk.bf16.vlgmr.msra.gmra.mrb[100].mxu0 %vm224_vm9, %v2566_v19 }
0x31ec   :  { %3358 = vmatpush3.bf16.msra.mxu0 %v4182_v9  ;;  %3361 = vmatprep.mubr.msk.bf16.mxu0 %vm3515_vm10, %v3514_v18 }
0x31ed   :  { %3359 = vmatprep.subr.bf16.mxu0 %v3514_v18 }
0x31f0   :  { %3360 = vmatpush3.bf16.msra.mxu0 %v4191_v0 }
0x32be   :  { %v2604_v6 = vpop.f32.mrb[100].mxu0 }
0x32bf   :  { %v2610_v7 = vadd.f32 %v2604_v6, %v3682_v23  ;;  %v3343_v17 = vpop.f32.mrb[101].mxu0 }
0x32c0   :  { %v2607_v41 = vpop.f32.mrb[102].mxu0 }
0x32c1   :  { %v2611_v54 = vmax.f32 %v2610_v7, 0.0  ;;  %v3344_v10 = vpop.f32.mrb[103].mxu0 }
0x32c3   :  { %v2612_v58 = vpack.c.bf16 %v2611_v54, %v2611_v54 }
0x32c5   :  { %v2615_v38 = vsel %vm224_vm9, %v2612_v58, %v4212_v2 }
0x32c6   :  { %3354 = vmatmul.mubr.msk.bf16.vlgmr.msra.gmra.mrb[72].mxu1 %vm599_vm13, %v2615_v38 }
0x3399   :  { %v2652_v9 = vpop.f32.mrb[72].mxu1 }
0x339a   :  { %v2653_v39 = vadd.f32 %v2652_v9, %v3764_v20  ;;  %v3355_v27 = vpop.f32.mrb[73].mxu1  ;;  %v54_v20 = vld [vmem:[%s4424_s3 + $0x90] sm:$0x1]  ;;  %s3520_s3 = smov 122  }
0x339b   :  { %v2655_v18 = vpop.f32.mrb[74].mxu1  ;;  %v55_v32 = vunpack.c.l.bf16 %v54_v20 }
0x339c   :  { %2665 = vrot.lane.b32.xlu0 %v2653_v39, %s3516_s30  ;;  %v3356_v0 = vpop.f32.mrb[75].mxu1  ;;  %v2847_v13 = vmul.f32 -1.442695, %v2653_v39  ;;  %s3519_s30 = smov 16  }
0x339d   :  { %v4267_v33 = vrot.slane %v55_v32, %v3646_v56 }
0x339e   :  { %3465 = vpow2.f32 %v2847_v13 }
0x339f   :  { %v729_v44 = vadd.f32 %v3808_v59, %v4267_v33  ;;  %v1015_v26 = vadd.f32 %v3870_v30, %v4267_v33  ;;  %v4289_v30 = vadd.f32 %v4066_v16, %v4267_v33  ;;  %v4294_v46 = vadd.f32 %v4138_v45, %v4267_v33 }
0x33a0   :  { %v1585_v38 = vadd.f32 %v3994_v43, %v4267_v33  ;;  %v4314_v9 = vadd.f32 %v4230_v63, %v4267_v33 }
0x33a1   :  { %v734_v36 = vsel %vm126_vm4, %v729_v44, -inf  ;;  %v1020_v28 = vsel %vm126_vm4, %v1015_v26, -inf  ;;  %v1875_v47 = vsel %vm126_vm4, %v4289_v30, -inf  ;;  %v2160_v22 = vsel %vm126_vm4, %v4294_v46, -inf }
0x33a8   :  { %v3466_v23 = vpop.eup %3465 }
0x33a9   :  { %v2661_v12 = vadd.f32 1.0, %v3466_v23 }
0x33ab   :  { %3467 = vrcp.f32 %v2661_v12 }
0x33b5   :  { %v3468_v21 = vpop.eup %3467 }
0x33b6   :  { %v2675_v56 = vsub.f32 1.0, %v3468_v21  ;;  %v2681_v59 = vmul.f32 %v3468_v21, %v4208_v60 }
0x340e   :  { %v2666_v24 = vpop.permute.xlu0 %2665 }
0x340f   :  { %v2668_v31 = vmul.f32 %v3468_v21, %v2666_v24 }
0x3411   :  { %2670 = vrot.lane.b32.xlu1 %v2668_v31, %s3517_s12 }
0x3483   :  { %v2671_v2 = vpop.permute.xlu1 %2670 }
0x3484   :  { %v2673_v15 = vadd.f32 %v2671_v2, %v2653_v39  ;;  %v1590_v39 = vsel %vm126_vm4, %v1585_v38, -inf }
0x3486   :  { %3469 = vtanh.f32 %v2673_v15 }
0x3490   :  { %v3470_v42 = vpop.eup %3469 }
0x3491   :  { %2677 = vrot.lane.b32.xlu0 %v3470_v42, %s3518_s17 }
0x34b0   :  { %735 = vmax.xlane.f32.xlu0 %v734_v36 }
0x34c6   :  { %747 = vrot.lane.b32.xlu0 %v3712_v48, %s3519_s30  ;;  %v1300_v48 = vadd.f32 %v3932_v57, %v4267_v33 }
0x34e5   :  { %1021 = vmax.xlane.f32.xlu0 %v1020_v28 }
0x34fb   :  { %1033 = vrot.lane.b32.xlu0 %v3813_v29, %s3519_s30  ;;  %v1305_v29 = vsel %vm126_vm4, %v1300_v48, -inf }
0x3503   :  { %v2678_v51 = vpop.permute.xlu0 %2677 }
0x3504   :  { %v2680_v50 = vmul.f32 %v2678_v51, %v2675_v56 }
0x3506   :  { %v4280_v37 = vadd.f32 %v2681_v59, %v2680_v50 }
0x3508   :  { %v2683_v14 = vpack.c.bf16 %v4280_v37, %v4280_v37 }
0x350a   :  { %2685 = vrot.lane.b32.xlu1 %v2683_v14, %s3518_s17 }
0x351a   :  { %1306 = vmax.xlane.f32.xlu0 %v1305_v29 }
0x351e   :  { %1876 = vmax.xlane.f32.xlu0 %v1875_v47 }
0x3522   :  { %2161 = vmax.xlane.f32.xlu0 %v2160_v22 }
0x353d   :  { %v736_v57 = vpop.xlane.xlu0 %735 }
0x353e   :  { %v737_v52 = vsub.f32 %v729_v44, %v736_v57 }
0x3540   :  { %v738_v19 = vmul.f32 1.442695, %v737_v52 }
0x3541   :  { %v748_v45 = vpop.permute.xlu0 %747 }
0x3542   :  { %3471 = vpow2.f32 %v738_v19 }
0x354c   :  { %v3472_v16 = vpop.eup %3471 }
0x354d   :  { %v740_v61 = vsel %vm126_vm4, %v3472_v16, 0.0 }
0x354e   :  { %741 = vadd.xlane.f32.xlu1 %v740_v61 }
0x355f   :  { %751 = vrot.lane.b32.xlu1 %v3786_v55, %s3520_s3 }
0x3572   :  { %v1022_v49 = vpop.xlane.xlu0 %1021 }
0x3573   :  { %v1023_v4 = vsub.f32 %v1015_v26, %v1022_v49 }
0x3575   :  { %v1024_v6 = vmul.f32 1.442695, %v1023_v4 }
0x3576   :  { %v1034_v54 = vpop.permute.xlu0 %1033 }
0x3577   :  { %3473 = vpow2.f32 %v1024_v6 }
0x357c   :  { %v2686_v7 = vpop.permute.xlu1 %2685 }
0x357d   :  { %3362 = vmatmul.mubr.msk.bf16.vlgmr.msra.gmra.mrb[104].mxu0 %vm224_vm9, %v2686_v7 }
0x3581   :  { %v3474_v17 = vpop.eup %3473 }
0x3582   :  { %v1026_v41 = vsel %vm126_vm4, %v3474_v17, 0.0 }
0x3583   :  { %1027 = vadd.xlane.f32.xlu1 %v1026_v41 }
0x3594   :  { %1037 = vrot.lane.b32.xlu1 %v3848_v25, %s3520_s3  ;;  %v2445_v25 = vsel %vm126_vm4, %v4314_v9, -inf }
0x35a7   :  { %v1307_v10 = vpop.xlane.xlu0 %1306 }
0x35a8   :  { %v4307_v58 = vsub.f32 %v1300_v48, %v1307_v10 }
0x35aa   :  { %v1309_v55 = vmul.f32 1.442695, %v4307_v58 }
0x35ac   :  { %3475 = vpow2.f32 %v1309_v55 }
0x35b6   :  { %v3476_v27 = vpop.eup %3475 }
0x35b7   :  { %v1311_v18 = vsel %vm126_vm4, %v3476_v27, 0.0 }
0x35b8   :  { %1591 = vmax.xlane.f32.xlu1 %v1590_v39 }
0x35bc   :  { %2446 = vmax.xlane.f32.xlu1 %v2445_v25 }
0x35c0   :  { %1312 = vadd.xlane.f32.xlu1 %v1311_v18 }
0x35d1   :  { %1322 = vrot.lane.b32.xlu1 %v3910_v62, %s3520_s3 }
0x35db   :  { %v742_v0 = vpop.xlane.xlu1 %741 }
0x35dc   :  { %3477 = vlog2.f32 %v742_v0 }
0x35df   :  { %v752_v23 = vpop.permute.xlu1 %751 }
0x35e6   :  { %v3478_v43 = vpop.eup %3477 }
0x35e7   :  { %v744_v13 = vmul.f32 0.6931472, %v3478_v43 }
0x35e9   :  { %v745_v63 = vsub.f32 %v737_v52, %v744_v13 }
0x35eb   :  { %v754_v12 = vsel %vm126_vm4, %v745_v63, %v748_v45 }
0x35ec   :  { %v756_v21 = vsel %vm755_vm14, %v754_v12, %v752_v23 }
0x35ed   :  { %v758_v24 = vsel %vm757_vm15, %v756_v21, 0.0 }
0x35ee   :  { %759 = vst [vmem:[%s4427_s4] sm:$0xff] %v758_v24 }
0x3610   :  { %v1028_v31 = vpop.xlane.xlu1 %1027 }
0x3611   :  { %3479 = vlog2.f32 %v1028_v31 }
0x3614   :  { %v1038_v42 = vpop.permute.xlu1 %1037 }
0x361b   :  { %v3480_v62 = vpop.eup %3479 }
0x361c   :  { %v1030_v2 = vmul.f32 0.6931472, %v3480_v62 }
0x361e   :  { %v1031_v15 = vsub.f32 %v1023_v4, %v1030_v2 }
0x3620   :  { %v1040_v20 = vsel %vm126_vm4, %v1031_v15, %v1034_v54 }
0x3621   :  { %v1041_v32 = vsel %vm755_vm14, %v1040_v20, %v1038_v42 }
0x3622   :  { %v1042_v44 = vsel %vm757_vm15, %v1041_v32, 0.0 }
0x3623   :  { %2807 = vst [vmem:[%s4427_s4 + $0x8] sm:$0xff] %v1042_v44 }
0x3645   :  { %v1592_v36 = vpop.xlane.xlu1 %1591 }
0x3646   :  { %v4334_v26 = vsub.f32 %v1585_v38, %v1592_v36 }
0x3648   :  { %v1594_v28 = vmul.f32 1.442695, %v4334_v26 }
0x364a   :  { %3481 = vpow2.f32 %v1594_v28 }
0x3650   :  { %v2724_v56 = vpop.f32.mrb[104].mxu0 }
0x3651   :  { %v2725_v51 = vadd.f32 %v2724_v56, %v4267_v33  ;;  %v3363_v59 = vpop.f32.mrb[105].mxu0  ;;  %v1877_v33 = vpop.xlane.xlu0 %1876 }
0x3652   :  { %v2727_v50 = vpop.f32.mrb[106].mxu0 }
0x3653   :  { %v3364_v14 = vpop.f32.mrb[107].mxu0  ;;  %v2730_v48 = vsel %vm126_vm4, %v2725_v51, -inf }
0x3654   :  { %v3482_v29 = vpop.eup %3481  ;;  %2731 = vmax.xlane.f32.xlu0 %v2730_v48 }
0x3655   :  { %v1596_v47 = vsel %vm126_vm4, %v3482_v29, 0.0 }
0x3656   :  { %1597 = vadd.xlane.f32.xlu1 %v1596_v47 }
0x3667   :  { %1888 = vrot.lane.b32.xlu1 %v3999_v11, %s3519_s30 }
0x366a   :  { %1318 = vrot.lane.b32.xlu0 %v3875_v1, %s3519_s30  ;;  %v4357_v1 = vsub.f32 %v4289_v30, %v1877_v33 }
0x366b   :  { %1892 = vrot.lane.b32.xlu1 %v4034_v8, %s3520_s3 }
0x366c   :  { %v1879_v11 = vmul.f32 1.442695, %v4357_v1 }
0x366e   :  { %1603 = vrot.lane.b32.xlu0 %v3937_v34, %s3519_s30  ;;  %v2162_v34 = vpop.xlane.xlu0 %2161  ;;  %3483 = vpow2.f32 %v1879_v11 }
0x366f   :  { %2458 = vrot.lane.b32.xlu1 %v4143_v3, %s3519_s30  ;;  %v4363_v8 = vsub.f32 %v4294_v46, %v2162_v34 }
0x3671   :  { %v2164_v3 = vmul.f32 1.442695, %v4363_v8 }
0x3672   :  { %1607 = vrot.lane.b32.xlu0 %v3972_v5, %s3520_s3  ;;  %v2447_v5 = vpop.xlane.xlu1 %2446 }
0x3673   :  { %2743 = vrot.lane.b32.xlu1 %v4235_v53, %s3519_s30  ;;  %3485 = vpow2.f32 %v2164_v3 }
0x3676   :  { %v1313_v52 = vpop.xlane.xlu1 %1312 }
0x3677   :  { %2177 = vrot.lane.b32.xlu1 %v4106_v35, %s3520_s3  ;;  %v4369_v35 = vsub.f32 %v4314_v9, %v2447_v5 }
0x3679   :  { %v2449_v53 = vmul.f32 1.442695, %v4369_v35 }
0x367a   :  { %v1323_v16 = vpop.permute.xlu1 %1322 }
0x367b   :  { %2462 = vrot.lane.b32.xlu1 %v4208_v60, %s3520_s3  ;;  %3487 = vpow2.f32 %v2449_v53  ;;  %v3484_v60 = vpop.eup %3483 }
0x367c   :  { %v1881_v30 = vsel %vm126_vm4, %v3484_v60, 0.0  ;;  %3489 = vlog2.f32 %v1313_v52 }
0x367d   :  { %v3486_v22 = vpop.eup %3485 }
0x367e   :  { %v2166_v46 = vsel %vm126_vm4, %v3486_v22, 0.0 }
0x367f   :  { %2747 = vrot.lane.b32.xlu1 %v4280_v37, %s3520_s3 }
0x3685   :  { %v3488_v57 = vpop.eup %3487 }
0x3686   :  { %v2451_v37 = vsel %vm126_vm4, %v3488_v57, 0.0  ;;  %v3490_v19 = vpop.eup %3489 }
0x3687   :  { %v1315_v61 = vmul.f32 0.6931472, %v3490_v19 }
0x3689   :  { %v1316_v6 = vsub.f32 %v4307_v58, %v1315_v61 }
0x3691   :  { %1882 = vadd.xlane.f32.xlu0 %v1881_v30 }
0x3695   :  { %2167 = vadd.xlane.f32.xlu0 %v2166_v46 }
0x3699   :  { %2452 = vadd.xlane.f32.xlu0 %v2451_v37 }
0x36e1   :  { %v2732_v45 = vpop.xlane.xlu0 %2731 }
0x36e2   :  { %v4375_v49 = vsub.f32 %v2725_v51, %v2732_v45 }
0x36e3   :  { %v1598_v4 = vpop.xlane.xlu1 %1597 }
0x36e4   :  { %v2734_v7 = vmul.f32 1.442695, %v4375_v49  ;;  %3491 = vlog2.f32 %v1598_v4 }
0x36e5   :  { %v1319_v17 = vpop.permute.xlu0 %1318 }
0x36e6   :  { %3493 = vpow2.f32 %v2734_v7  ;;  %v1325_v41 = vsel %vm126_vm4, %v1316_v6, %v1319_v17 }
0x36e7   :  { %v1326_v54 = vsel %vm755_vm14, %v1325_v41, %v1323_v16  ;;  %v1889_v13 = vpop.permute.xlu1 %1888 }
0x36e8   :  { %v1327_v10 = vsel %vm757_vm15, %v1326_v54, 0.0 }
0x36e9   :  { %2814 = vst [vmem:[%s4427_s4 + $0x10] sm:$0xff] %v1327_v10  ;;  %v1604_v55 = vpop.permute.xlu0 %1603 }
0x36eb   :  { %v1893_v63 = vpop.permute.xlu1 %1892 }
0x36ed   :  { %v1608_v18 = vpop.permute.xlu0 %1607 }
0x36ee   :  { %v3492_v38 = vpop.eup %3491 }
0x36ef   :  { %v1600_v9 = vmul.f32 0.6931472, %v3492_v38  ;;  %v2459_v21 = vpop.permute.xlu1 %2458 }
0x36f0   :  { %v3494_v39 = vpop.eup %3493 }
0x36f1   :  { %v1601_v58 = vsub.f32 %v4334_v26, %v1600_v9  ;;  %v2736_v25 = vsel %vm126_vm4, %v3494_v39, 0.0 }
0x36f2   :  { %2737 = vadd.xlane.f32.xlu0 %v2736_v25 }
0x36f3   :  { %v1610_v27 = vsel %vm126_vm4, %v1601_v58, %v1604_v55  ;;  %v2744_v62 = vpop.permute.xlu1 %2743 }
0x36f4   :  { %v1611_v0 = vsel %vm755_vm14, %v1610_v27, %v1608_v18 }
0x36f5   :  { %v1612_v43 = vsel %vm757_vm15, %v1611_v0, 0.0 }
0x36f6   :  { %2821 = vst [vmem:[%s4427_s4 + $0x18] sm:$0xff] %v1612_v43 }
0x36f7   :  { %v2178_v32 = vpop.permute.xlu1 %2177 }
0x36fb   :  { %v2463_v28 = vpop.permute.xlu1 %2462 }
0x3708   :  { %2173 = vrot.lane.b32.xlu0 %v4071_v40, %s3519_s30 }
0x371e   :  { %v1883_v23 = vpop.xlane.xlu0 %1882 }
0x371f   :  { %3495 = vlog2.f32 %v1883_v23 }
0x3722   :  { %v2168_v12 = vpop.xlane.xlu0 %2167 }
0x3726   :  { %v2453_v24 = vpop.xlane.xlu0 %2452 }
0x3727   :  { %3497 = vlog2.f32 %v2453_v24 }
0x3728   :  { %3499 = vlog2.f32 %v2168_v12 }
0x3729   :  { %v3496_v31 = vpop.eup %3495 }
0x372a   :  { %v1885_v2 = vmul.f32 0.6931472, %v3496_v31 }
0x372c   :  { %v1886_v15 = vsub.f32 %v4357_v1, %v1885_v2 }
0x372e   :  { %v1895_v42 = vsel %vm126_vm4, %v1886_v15, %v1889_v13 }
0x372f   :  { %v1896_v20 = vsel %vm755_vm14, %v1895_v42, %v1893_v63 }
0x3730   :  { %v1897_v40 = vsel %vm757_vm15, %v1896_v20, 0.0 }
0x3731   :  { %v3498_v44 = vpop.eup %3497  ;;  %2828 = vst [vmem:[%s4427_s4 + $0x20] sm:$0xff] %v1897_v40 }
0x3732   :  { %v2455_v36 = vmul.f32 0.6931472, %v3498_v44  ;;  %v3500_v50 = vpop.eup %3499 }
0x3733   :  { %v2170_v14 = vmul.f32 0.6931472, %v3500_v50 }
0x3734   :  { %v2456_v26 = vsub.f32 %v4369_v35, %v2455_v36  ;;  %v2748_v35 = vpop.permute.xlu1 %2747 }
0x3735   :  { %v2171_v29 = vsub.f32 %v4363_v8, %v2170_v14 }
0x3736   :  { %v2465_v56 = vsel %vm126_vm4, %v2456_v26, %v2459_v21 }
0x3737   :  { %v2466_v51 = vsel %vm755_vm14, %v2465_v56, %v2463_v28 }
0x3738   :  { %v2467_v59 = vsel %vm757_vm15, %v2466_v51, 0.0 }
0x3739   :  { %2842 = vst [vmem:[%s4427_s4 + $0x30] sm:$0xff] %v2467_v59 }
0x377f   :  { %v2738_v48 = vpop.xlane.xlu0 %2737 }
0x3780   :  { %3501 = vlog2.f32 %v2738_v48 }
0x3783   :  { %v2174_v47 = vpop.permute.xlu0 %2173 }
0x3784   :  { %v2180_v33 = vsel %vm126_vm4, %v2171_v29, %v2174_v47 }
0x3785   :  { %v2181_v1 = vsel %vm755_vm14, %v2180_v33, %v2178_v32 }
0x3786   :  { %v2182_v34 = vsel %vm757_vm15, %v2181_v1, 0.0 }
0x3787   :  { %2835 = vst [vmem:[%s4427_s4 + $0x28] sm:$0xff] %v2182_v34 }
0x378a   :  { %v3502_v11 = vpop.eup %3501 }
0x378b   :  { %v2740_v5 = vmul.f32 0.6931472, %v3502_v11 }
0x378d   :  { %v2741_v3 = vsub.f32 %v4375_v49, %v2740_v5 }
0x378f   :  { %v2750_v53 = vsel %vm126_vm4, %v2741_v3, %v2744_v62 }
0x3790   :  { %v2751_v8 = vsel %vm755_vm14, %v2750_v53, %v2748_v35 }
0x3791   :  { %v2752_v60 = vsel %vm757_vm15, %v2751_v8, 0.0 }
0x3792   :  { %2849 = vst [vmem:[%s4427_s4 + $0x38] sm:$0xff] %v2752_v60 }

</bundles_post_ra>
